<compile_context>
chip_gen: v7x
topology: tpu7x:2x2x1
jax: 0.10.0
libtpu: 0.0.40
codegen_flags: <defaults>
</compile_context>

<pallas_src>
import math

import jax
import jax.numpy as jnp
from jax.experimental import pallas as pl
from jax.experimental.pallas import tpu as pltpu

_LANES = 128


def _round_up(x, m):
    return (x + m - 1) // m * m


# ----------------------------------------------------------------------------
# Parameter packing: ONE (rows, 128) f32 slab -> single kernel DMA.
# ----------------------------------------------------------------------------
_PARAM_ORDER = (
    "ae_in_w", "ae_in_b", "ae_out_w", "ae_out_b",
    "w_ih0_cat", "w_ih0_real", "b_ih0",
    "w_hh0", "b_hh0",
    "w_ih1", "w_hh1", "b_ih1", "b_hh1",
    "fc21_w", "fc21_b", "fc22_w", "fc22_b", "fc3_w", "fc3_b",
)


def pack_params(p):
    """layout[name] = (row_offset, rows, cols); row offsets 8-aligned so every
    in-kernel slice is sublane aligned.  Unused rows/lanes are zero."""
    layout = {}
    blocks = []
    off = 0
    for name in _PARAM_ORDER:
        t = jnp.asarray(p[name], jnp.float32)
        r, c = t.shape
        rp = _round_up(r, 8)
        blocks.append(jnp.zeros((rp, _LANES), jnp.float32).at[:r, :c].set(t))
        layout[name] = (off, r, c)
        off += rp
    return jnp.concatenate(blocks, axis=0), layout


# ----------------------------------------------------------------------------
# Pallas kernel: one batch tile's full forward pass, entirely in VMEM.
# ----------------------------------------------------------------------------
def _make_kernel(layout, BT, T, H, offsets, out_w):
    H2 = 2 * H
    o_real, o_e2, o_rec, o_emb = offsets
    out_real = layout["fc3_w"][2]
    C_out = layout["ae_out_w"][2]
    Hc = layout["ae_in_w"][2]

    def getp(ref, name):
        off, r, c = layout[name]          # static python ints -> static slices
        return ref[off:off + r, :c]       # once-per-call loads, off the chain

    def kernel(p_ref, cat_ref, real_ref, out_ref):
        f32 = jnp.float32

        # ---- categorical autoencoder branch ----
        cat_emb = jax.nn.sigmoid(
            jnp.dot(cat_ref[...], getp(p_ref, "ae_in_w"),
                    preferred_element_type=f32) + getp(p_ref, "ae_in_b"))
        logits = (jnp.dot(cat_emb, getp(p_ref, "ae_out_w"),
                          preferred_element_type=f32)
                  + getp(p_ref, "ae_out_b"))
        m = jnp.max(logits, axis=1, keepdims=True)
        e = jnp.exp(logits - m)
        cat_recon = e * pl.reciprocal(jnp.sum(e, axis=1, keepdims=True),
                                      approx=True)           # softmax(dim=1)

        # ---- loop-invariant weights (loaded once, as values) ----
        w_ih0_real = getp(p_ref, "w_ih0_real")   # (F, 3H)
        w_hh0 = getp(p_ref, "w_hh0")             # (H, 3H)
        w_hh1 = getp(p_ref, "w_hh1")             # (H, 3H)
        w_ih1 = getp(p_ref, "w_ih1")             # (H, 3H)
        b_hh0 = getp(p_ref, "b_hh0")
        b_hh1 = getp(p_ref, "b_hh1")
        b_ih1 = getp(p_ref, "b_ih1")

        # Loop-invariant categorical contribution to layer-0 gates (+ bias).
        gx_base = (jnp.dot(cat_emb, getp(p_ref, "w_ih0_cat"),
                           preferred_element_type=f32) + getp(p_ref, "b_ih0"))
        # Hoisted per-step input projections: real_ref is time-major
        # (T, BT, F), so real_ref[t] is a contiguous sublane-aligned tile.
        # No scratch, no strided loads; independent of h -> pipelines freely.
        gx_t = [gx_base + jnp.dot(real_ref[t], w_ih0_real,
                                  preferred_element_type=f32)
                for t in range(T)]

        def gru_gates(gx, gh, h_prev):
            # One sigmoid over the fused r|z slab, then tanh for n.
            rz = jax.nn.sigmoid(gx[:, :H2] + gh[:, :H2])
            r, z = rz[:, :H], rz[:, H:]
            n = jnp.tanh(gx[:, H2:] + r * gh[:, H2:])
            return (1.0 - z) * n + z * h_prev

        # TODO(synk): on v6e/v7x the loop-invariant w_hh0/w_hh1/w_ih1 could be
        # staged in MXU weight registers via pltpu.matmul_push_rhs; kept on
        # the portable jnp.dot path here.
        h0 = jnp.zeros((BT, H), f32)
        h1 = jnp.zeros((BT, H), f32)
        for t in range(T):                 # T static -> fully unrolled
            # Two back-to-back hidden-state matmuls (no lane-concat of h0|h1).
            gh0 = jnp.dot(h0, w_hh0, preferred_element_type=f32) + b_hh0
            gh1 = jnp.dot(h1, w_hh1, preferred_element_type=f32) + b_hh1
            h0 = gru_gates(gx_t[t], gh0, h0)
            gx1 = jnp.dot(h0, w_ih1, preferred_element_type=f32) + b_ih1
            h1 = gru_gates(gx1, gh1, h1)

        # ---- MLP head on the last layer's hidden state ----
        # TODO(synk): nn.Dropout(p=0.6) is modeled in eval mode (identity);
        #             bn1 (BatchNorm1d) is defined but unused in forward().
        e1 = jnp.maximum(
            jnp.dot(h1, getp(p_ref, "fc21_w"), preferred_element_type=f32)
            + getp(p_ref, "fc21_b"), 0.0)
        e2 = jnp.maximum(
            jnp.dot(e1, getp(p_ref, "fc22_w"), preferred_element_type=f32)
            + getp(p_ref, "fc22_b"), 0.0)
        real_out = (jnp.dot(e2, getp(p_ref, "fc3_w"),
                            preferred_element_type=f32) + getp(p_ref, "fc3_b"))

        # ---- packed output: each result at a 32-lane-aligned static offset --
        out_ref[...] = jnp.zeros((BT, out_w), f32)
        out_ref[:, o_real:o_real + out_real] = real_out
        out_ref[:, o_e2:o_e2 + H] = e2
        out_ref[:, o_rec:o_rec + C_out] = cat_recon
        out_ref[:, o_emb:o_emb + Hc] = cat_emb

    return kernel


# ----------------------------------------------------------------------------
# Wrapper
# ----------------------------------------------------------------------------
def global_recurrent_feature_forward(real_input, categorical_input, packed,
                                     layout, *, max_batch_tile=128):
    """real_input: (B, T, F) f32; categorical_input: (B, C_in) f32."""
    B, T, F = real_input.shape
    C_in, Hc = layout["ae_in_w"][1], layout["ae_in_w"][2]
    C_out = layout["ae_out_w"][2]
    H = layout["w_ih1"][1]
    out_real = layout["fc3_w"][2]

    # Lane-aligned output packing (real_out | e2 | cat_recon | cat_emb).
    o_real = 0
    o_e2 = o_real + _round_up(max(out_real, 1), 32)
    o_rec = o_e2 + _round_up(H, 32)
    o_emb = o_rec + _round_up(C_out, 32)
    out_w = _round_up(o_emb + Hc, _LANES)

    # Pad batch to a full sublane tile; shard batch tiles over a parallel grid
    # (engages both v7x TensorCores when B is large; 1 grid step at small B).
    BT = min(_round_up(max(B, 1), 8), max_batch_tile)
    Bp = _round_up(B, BT)
    nb = Bp // BT

    # Time-major real input: (B, T, F) -> (T, Bp, F).  Tiny transpose+pad,
    # fused by XLA in the wrapper; padded rows produce finite garbage that is
    # sliced off below and never leaks downstream.
    real_tm = jnp.transpose(real_input.astype(jnp.float32), (1, 0, 2))
    real_tm = jnp.pad(real_tm, ((0, 0), (0, Bp - B), (0, 0)))
    cat = jnp.pad(categorical_input.astype(jnp.float32),
                  ((0, Bp - B), (0, 0)))

    kernel = _make_kernel(layout, BT, T, H, (o_real, o_e2, o_rec, o_emb),
                          out_w)
    p_rows = packed.shape[0]

    flops = 2 * Bp * (C_in * Hc + Hc * C_out + Hc * 3 * H
                      + T * (F * 3 * H + 3 * H * 3 * H)
                      + 2 * H * H + H * out_real)
    transcendentals = Bp * (Hc + C_out + 1 + T * 2 * 3 * H)
    bytes_accessed = 4 * (packed.size + Bp * T * F + Bp * C_in + Bp * out_w)

    out = pl.pallas_call(
        kernel,
        out_shape=jax.ShapeDtypeStruct((Bp, out_w), jnp.float32),
        grid=(nb,),
        in_specs=[
            # Constant block index -> the param slab is DMA'd once, not per step.
            pl.BlockSpec((p_rows, _LANES), lambda i: (0, 0)),
            pl.BlockSpec((BT, C_in), lambda i: (i, 0)),
            pl.BlockSpec((T, BT, F), lambda i: (0, i, 0)),
        ],
        out_specs=pl.BlockSpec((BT, out_w), lambda i: (i, 0)),
        compiler_params=pltpu.CompilerParams(
            dimension_semantics=("parallel",)),
        cost_estimate=pl.CostEstimate(flops=flops,
                                      transcendentals=transcendentals,
                                      bytes_accessed=bytes_accessed),
    )(packed, cat, real_tm)

    real_out = out[:B, o_real:o_real + out_real]
    real_emb = out[:B, o_e2:o_e2 + H]
    cat_recon = out[:B, o_rec:o_rec + C_out]
    cat_emb = out[:B, o_emb:o_emb + Hc]
    return real_out, real_emb, cat_recon, cat_emb


# ----------------------------------------------------------------------------
# Deterministic parameter init (PyTorch-style uniform(-1/sqrt(fan_in), ...)).
# ----------------------------------------------------------------------------
def init_params(key, F, C_in, C_out, out_real, Hc=16, H=16):
    keys = jax.random.split(key, len(_PARAM_ORDER))
    kit = iter(keys)

    def u(shape, fan_in):
        b = 1.0 / math.sqrt(fan_in)
        return jax.random.uniform(next(kit), shape, jnp.float32, -b, b)

    p = {}
    p["ae_in_w"] = u((C_in, Hc), C_in)
    p["ae_in_b"] = u((1, Hc), C_in)
    p["ae_out_w"] = u((Hc, C_out), Hc)
    p["ae_out_b"] = u((1, C_out), Hc)
    # GRU layer 0 (input = Hc + F), split into categorical / real column blocks
    p["w_ih0_cat"] = u((Hc, 3 * H), H)
    p["w_ih0_real"] = u((F, 3 * H), H)
    p["b_ih0"] = u((1, 3 * H), H)
    p["w_hh0"] = u((H, 3 * H), H)
    p["b_hh0"] = u((1, 3 * H), H)
    # GRU layer 1 (input = H)
    p["w_ih1"] = u((H, 3 * H), H)
    p["w_hh1"] = u((H, 3 * H), H)
    p["b_ih1"] = u((1, 3 * H), H)
    p["b_hh1"] = u((1, 3 * H), H)
    # head
    p["fc21_w"] = u((H, H), H)
    p["fc21_b"] = u((1, H), H)
    p["fc22_w"] = u((H, H), H)
    p["fc22_b"] = u((1, H), H)
    p["fc3_w"] = u((H, out_real), H)
    p["fc3_b"] = u((1, out_real), H)
    return p


# ----------------------------------------------------------------------------
# Pure-JAX reference (mirrors the PyTorch forward in eval mode).
# ----------------------------------------------------------------------------
def reference_forward(real_input, categorical_input, p):
    H = p["w_hh0"].shape[0]
    B, T, _ = real_input.shape

    cat_emb = jax.nn.sigmoid(categorical_input @ p["ae_in_w"] + p["ae_in_b"])
    cat_recon = jax.nn.softmax(cat_emb @ p["ae_out_w"] + p["ae_out_b"], axis=1)

    def cell(x, h, w_ih, w_hh, b_ih, b_hh):
        gx = x @ w_ih + b_ih
        gh = h @ w_hh + b_hh
        r = jax.nn.sigmoid(gx[:, :H] + gh[:, :H])
        z = jax.nn.sigmoid(gx[:, H:2 * H] + gh[:, H:2 * H])
        n = jnp.tanh(gx[:, 2 * H:] + r * gh[:, 2 * H:])
        return (1.0 - z) * n + z * h

    w_ih0 = jnp.concatenate([p["w_ih0_cat"], p["w_ih0_real"]], axis=0)
    h0 = jnp.zeros((B, H), jnp.float32)
    h1 = jnp.zeros((B, H), jnp.float32)
    for t in range(T):
        x_in = jnp.concatenate([cat_emb, real_input[:, t, :]], axis=1)
        h0 = cell(x_in, h0, w_ih0, p["w_hh0"], p["b_ih0"], p["b_hh0"])
        h1 = cell(h0, h1, p["w_ih1"], p["w_hh1"], p["b_ih1"], p["b_hh1"])

    e1 = jax.nn.relu(h1 @ p["fc21_w"] + p["fc21_b"])
    e2 = jax.nn.relu(e1 @ p["fc22_w"] + p["fc22_b"])
    real_out = e2 @ p["fc3_w"] + p["fc3_b"]
    return real_out, e2, cat_recon, cat_emb


if __name__ == "__main__":
    # Small shapes implied by the module:
    B, T = 4, 8                 # batch, number of past weeks
    F = 4                       # num_input_features (real exogenous features/step)
    C_in, C_out = 8, 8          # one-hot region size / reconstruction size
    Hc, H = 16, 16              # hidden_size_categorical / hidden_size_real
    out_real = 1                # K-week-ahead scalar forecast

    key = jax.random.PRNGKey(0)
    k_params, k_real = jax.random.split(key, 2)

    params = init_params(k_params, F, C_in, C_out, out_real, Hc=Hc, H=H)
    real_input = jax.random.normal(k_real, (B, T, F), dtype=jnp.float32)
    categorical_input = jax.nn.one_hot(jnp.arange(B) % C_in, C_in,
                                       dtype=jnp.float32)

    # Pack parameters once (one contiguous slab -> one kernel DMA per call).
    packed, layout = pack_params(params)

    fwd = jax.jit(lambda r, c, pk: global_recurrent_feature_forward(
        r, c, pk, layout))
    outs = jax.block_until_ready(fwd(real_input, categorical_input, packed))

    refs = reference_forward(real_input, categorical_input, params)
    for got, want in zip(outs, refs):
        assert got.shape == want.shape, (got.shape, want.shape)
        assert jnp.allclose(got, want, rtol=1e-2, atol=1e-2), (
            float(jnp.max(jnp.abs(got - want))))

    print("KERNEL_OK")
</pallas_src>

<mosaic_0001>
module attributes {stable_mosaic.version = 11 : i64} {
  func.func @kernel(%arg0: i32, %arg1: memref<216x128xf32, #tpu.memory_space<vmem>>, %arg2: memref<8x8xf32, #tpu.memory_space<vmem>>, %arg3: memref<8x8x4xf32, #tpu.memory_space<vmem>>, %arg4: memref<8x128xf32, #tpu.memory_space<vmem>>) attributes {dimension_semantics = [#tpu.dimension_semantics<parallel>], iteration_bounds = array<i64: 1>, scalar_prefetch = 0 : i64, scratch_operands = 0 : i64, tpu.core_type = #tpu.core_type<tc>, window_params = [{pipeline_mode = #tpu.pipeline_mode<synchronous>, transform_indices = @transform_0, window_bounds = array<i64: 216, 128>}, {transform_indices = @transform_1, window_bounds = array<i64: 8, 8>}, {transform_indices = @transform_2, window_bounds = array<i64: 8, 8, 4>}, {transform_indices = @transform_3, window_bounds = array<i64: 8, 128>}]} {
    %c0 = arith.constant 0 : index
    %c0_0 = arith.constant 0 : index
    %0 = vector.load %arg2[%c0, %c0_0] : memref<8x8xf32, #tpu.memory_space<vmem>>, vector<8x8xf32>
    %c0_1 = arith.constant 0 : index
    %c0_2 = arith.constant 0 : index
    %1 = vector.load %arg1[%c0_1, %c0_2] : memref<216x128xf32, #tpu.memory_space<vmem>>, vector<8x16xf32>
    %cst = arith.constant dense<0.000000e+00> : vector<8x16xf32>
    %2 = tpu.matmul %0, %1, %cst {dimension_numbers = #tpu.dot_dimension_numbers<[1], [0], [0], [1], [0, 0, 1, 1], [], []>} : vector<8x8xf32>, vector<8x16xf32>, vector<8x16xf32> -> vector<8x16xf32>
    %c8 = arith.constant 8 : index
    %c0_3 = arith.constant 0 : index
    %3 = vector.load %arg1[%c8, %c0_3] : memref<216x128xf32, #tpu.memory_space<vmem>>, vector<1x16xf32>
    %4 = vector.broadcast %3 : vector<1x16xf32> to vector<8x16xf32>
    %5 = arith.addf %2, %4 : vector<8x16xf32>
    %6 = arith.negf %5 : vector<8x16xf32>
    %7 = math.exp %6 : vector<8x16xf32>
    %cst_4 = arith.constant 1.000000e+00 : f32
    %8 = vector.broadcast %cst_4 : f32 to vector<8x16xf32>
    %9 = arith.addf %8, %7 : vector<8x16xf32>
    %10 = arith.divf %8, %9 : vector<8x16xf32>
    %c16 = arith.constant 16 : index
    %c0_5 = arith.constant 0 : index
    %11 = vector.load %arg1[%c16, %c0_5] : memref<216x128xf32, #tpu.memory_space<vmem>>, vector<16x8xf32>
    %cst_6 = arith.constant dense<0.000000e+00> : vector<8x8xf32>
    %12 = tpu.matmul %10, %11, %cst_6 {dimension_numbers = #tpu.dot_dimension_numbers<[1], [0], [0], [1], [0, 0, 1, 1], [], []>} : vector<8x16xf32>, vector<16x8xf32>, vector<8x8xf32> -> vector<8x8xf32>
    %c32 = arith.constant 32 : index
    %c0_7 = arith.constant 0 : index
    %13 = vector.load %arg1[%c32, %c0_7] : memref<216x128xf32, #tpu.memory_space<vmem>>, vector<1x8xf32>
    %14 = vector.broadcast %13 : vector<1x8xf32> to vector<8x8xf32>
    %15 = arith.addf %12, %14 : vector<8x8xf32>
    %cst_8 = arith.constant dense<0xFF800000> : vector<8xf32>
    %16 = vector.multi_reduction <maximumf>, %15, %cst_8 [1] : vector<8x8xf32> to vector<8xf32>
    %17 = vector.shape_cast %16 : vector<8xf32> to vector<8x1xf32>
    %18 = vector.broadcast %17 : vector<8x1xf32> to vector<8x8xf32>
    %19 = arith.subf %15, %18 : vector<8x8xf32>
    %20 = math.exp %19 : vector<8x8xf32>
    %cst_9 = arith.constant dense<0.000000e+00> : vector<8xf32>
    %21 = vector.multi_reduction <add>, %20, %cst_9 [1] : vector<8x8xf32> to vector<8xf32>
    %22 = vector.shape_cast %21 : vector<8xf32> to vector<8x1xf32>
    %23 = tpu.reciprocal %22 {approx = true} : vector<8x1xf32> -> vector<8x1xf32>
    %24 = vector.broadcast %23 : vector<8x1xf32> to vector<8x8xf32>
    %25 = arith.mulf %20, %24 : vector<8x8xf32>
    %c56 = arith.constant 56 : index
    %c0_10 = arith.constant 0 : index
    %26 = vector.load %arg1[%c56, %c0_10] : memref<216x128xf32, #tpu.memory_space<vmem>>, vector<4x48xf32>
    %c72 = arith.constant 72 : index
    %c0_11 = arith.constant 0 : index
    %27 = vector.load %arg1[%c72, %c0_11] : memref<216x128xf32, #tpu.memory_space<vmem>>, vector<16x48xf32>
    %c112 = arith.constant 112 : index
    %c0_12 = arith.constant 0 : index
    %28 = vector.load %arg1[%c112, %c0_12] : memref<216x128xf32, #tpu.memory_space<vmem>>, vector<16x48xf32>
    %c96 = arith.constant 96 : index
    %c0_13 = arith.constant 0 : index
    %29 = vector.load %arg1[%c96, %c0_13] : memref<216x128xf32, #tpu.memory_space<vmem>>, vector<16x48xf32>
    %c88 = arith.constant 88 : index
    %c0_14 = arith.constant 0 : index
    %30 = vector.load %arg1[%c88, %c0_14] : memref<216x128xf32, #tpu.memory_space<vmem>>, vector<1x48xf32>
    %c136 = arith.constant 136 : index
    %c0_15 = arith.constant 0 : index
    %31 = vector.load %arg1[%c136, %c0_15] : memref<216x128xf32, #tpu.memory_space<vmem>>, vector<1x48xf32>
    %c128 = arith.constant 128 : index
    %c0_16 = arith.constant 0 : index
    %32 = vector.load %arg1[%c128, %c0_16] : memref<216x128xf32, #tpu.memory_space<vmem>>, vector<1x48xf32>
    %c40 = arith.constant 40 : index
    %c0_17 = arith.constant 0 : index
    %33 = vector.load %arg1[%c40, %c0_17] : memref<216x128xf32, #tpu.memory_space<vmem>>, vector<16x48xf32>
    %cst_18 = arith.constant dense<0.000000e+00> : vector<8x48xf32>
    %34 = tpu.matmul %10, %33, %cst_18 {dimension_numbers = #tpu.dot_dimension_numbers<[1], [0], [0], [1], [0, 0, 1, 1], [], []>} : vector<8x16xf32>, vector<16x48xf32>, vector<8x48xf32> -> vector<8x48xf32>
    %c64 = arith.constant 64 : index
    %c0_19 = arith.constant 0 : index
    %35 = vector.load %arg1[%c64, %c0_19] : memref<216x128xf32, #tpu.memory_space<vmem>>, vector<1x48xf32>
    %36 = vector.broadcast %35 : vector<1x48xf32> to vector<8x48xf32>
    %37 = arith.addf %34, %36 : vector<8x48xf32>
    %c0_20 = arith.constant 0 : index
    %c0_21 = arith.constant 0 : index
    %c0_22 = arith.constant 0 : index
    %38 = vector.load %arg3[%c0_20, %c0_21, %c0_22] : memref<8x8x4xf32, #tpu.memory_space<vmem>>, vector<1x8x4xf32>
    %39 = vector.shape_cast %38 : vector<1x8x4xf32> to vector<8x4xf32>
    %cst_23 = arith.constant dense<0.000000e+00> : vector<8x48xf32>
    %40 = tpu.matmul %39, %26, %cst_23 {dimension_numbers = #tpu.dot_dimension_numbers<[1], [0], [0], [1], [0, 0, 1, 1], [], []>} : vector<8x4xf32>, vector<4x48xf32>, vector<8x48xf32> -> vector<8x48xf32>
    %41 = arith.addf %37, %40 : vector<8x48xf32>
    %c1 = arith.constant 1 : index
    %c0_24 = arith.constant 0 : index
    %c0_25 = arith.constant 0 : index
    %42 = vector.load %arg3[%c1, %c0_24, %c0_25] : memref<8x8x4xf32, #tpu.memory_space<vmem>>, vector<1x8x4xf32>
    %43 = vector.shape_cast %42 : vector<1x8x4xf32> to vector<8x4xf32>
    %cst_26 = arith.constant dense<0.000000e+00> : vector<8x48xf32>
    %44 = tpu.matmul %43, %26, %cst_26 {dimension_numbers = #tpu.dot_dimension_numbers<[1], [0], [0], [1], [0, 0, 1, 1], [], []>} : vector<8x4xf32>, vector<4x48xf32>, vector<8x48xf32> -> vector<8x48xf32>
    %45 = arith.addf %37, %44 : vector<8x48xf32>
    %c2 = arith.constant 2 : index
    %c0_27 = arith.constant 0 : index
    %c0_28 = arith.constant 0 : index
    %46 = vector.load %arg3[%c2, %c0_27, %c0_28] : memref<8x8x4xf32, #tpu.memory_space<vmem>>, vector<1x8x4xf32>
    %47 = vector.shape_cast %46 : vector<1x8x4xf32> to vector<8x4xf32>
    %cst_29 = arith.constant dense<0.000000e+00> : vector<8x48xf32>
    %48 = tpu.matmul %47, %26, %cst_29 {dimension_numbers = #tpu.dot_dimension_numbers<[1], [0], [0], [1], [0, 0, 1, 1], [], []>} : vector<8x4xf32>, vector<4x48xf32>, vector<8x48xf32> -> vector<8x48xf32>
    %49 = arith.addf %37, %48 : vector<8x48xf32>
    %c3 = arith.constant 3 : index
    %c0_30 = arith.constant 0 : index
    %c0_31 = arith.constant 0 : index
    %50 = vector.load %arg3[%c3, %c0_30, %c0_31] : memref<8x8x4xf32, #tpu.memory_space<vmem>>, vector<1x8x4xf32>
    %51 = vector.shape_cast %50 : vector<1x8x4xf32> to vector<8x4xf32>
    %cst_32 = arith.constant dense<0.000000e+00> : vector<8x48xf32>
    %52 = tpu.matmul %51, %26, %cst_32 {dimension_numbers = #tpu.dot_dimension_numbers<[1], [0], [0], [1], [0, 0, 1, 1], [], []>} : vector<8x4xf32>, vector<4x48xf32>, vector<8x48xf32> -> vector<8x48xf32>
    %53 = arith.addf %37, %52 : vector<8x48xf32>
    %c4 = arith.constant 4 : index
    %c0_33 = arith.constant 0 : index
    %c0_34 = arith.constant 0 : index
    %54 = vector.load %arg3[%c4, %c0_33, %c0_34] : memref<8x8x4xf32, #tpu.memory_space<vmem>>, vector<1x8x4xf32>
    %55 = vector.shape_cast %54 : vector<1x8x4xf32> to vector<8x4xf32>
    %cst_35 = arith.constant dense<0.000000e+00> : vector<8x48xf32>
    %56 = tpu.matmul %55, %26, %cst_35 {dimension_numbers = #tpu.dot_dimension_numbers<[1], [0], [0], [1], [0, 0, 1, 1], [], []>} : vector<8x4xf32>, vector<4x48xf32>, vector<8x48xf32> -> vector<8x48xf32>
    %57 = arith.addf %37, %56 : vector<8x48xf32>
    %c5 = arith.constant 5 : index
    %c0_36 = arith.constant 0 : index
    %c0_37 = arith.constant 0 : index
    %58 = vector.load %arg3[%c5, %c0_36, %c0_37] : memref<8x8x4xf32, #tpu.memory_space<vmem>>, vector<1x8x4xf32>
    %59 = vector.shape_cast %58 : vector<1x8x4xf32> to vector<8x4xf32>
    %cst_38 = arith.constant dense<0.000000e+00> : vector<8x48xf32>
    %60 = tpu.matmul %59, %26, %cst_38 {dimension_numbers = #tpu.dot_dimension_numbers<[1], [0], [0], [1], [0, 0, 1, 1], [], []>} : vector<8x4xf32>, vector<4x48xf32>, vector<8x48xf32> -> vector<8x48xf32>
    %61 = arith.addf %37, %60 : vector<8x48xf32>
    %c6 = arith.constant 6 : index
    %c0_39 = arith.constant 0 : index
    %c0_40 = arith.constant 0 : index
    %62 = vector.load %arg3[%c6, %c0_39, %c0_40] : memref<8x8x4xf32, #tpu.memory_space<vmem>>, vector<1x8x4xf32>
    %63 = vector.shape_cast %62 : vector<1x8x4xf32> to vector<8x4xf32>
    %cst_41 = arith.constant dense<0.000000e+00> : vector<8x48xf32>
    %64 = tpu.matmul %63, %26, %cst_41 {dimension_numbers = #tpu.dot_dimension_numbers<[1], [0], [0], [1], [0, 0, 1, 1], [], []>} : vector<8x4xf32>, vector<4x48xf32>, vector<8x48xf32> -> vector<8x48xf32>
    %65 = arith.addf %37, %64 : vector<8x48xf32>
    %c7 = arith.constant 7 : index
    %c0_42 = arith.constant 0 : index
    %c0_43 = arith.constant 0 : index
    %66 = vector.load %arg3[%c7, %c0_42, %c0_43] : memref<8x8x4xf32, #tpu.memory_space<vmem>>, vector<1x8x4xf32>
    %67 = vector.shape_cast %66 : vector<1x8x4xf32> to vector<8x4xf32>
    %cst_44 = arith.constant dense<0.000000e+00> : vector<8x48xf32>
    %68 = tpu.matmul %67, %26, %cst_44 {dimension_numbers = #tpu.dot_dimension_numbers<[1], [0], [0], [1], [0, 0, 1, 1], [], []>} : vector<8x4xf32>, vector<4x48xf32>, vector<8x48xf32> -> vector<8x48xf32>
    %69 = arith.addf %37, %68 : vector<8x48xf32>
    %cst_45 = arith.constant 0.000000e+00 : f32
    %70 = vector.broadcast %cst_45 : f32 to vector<8x16xf32>
    %cst_46 = arith.constant 0.000000e+00 : f32
    %71 = vector.broadcast %cst_46 : f32 to vector<8x16xf32>
    %cst_47 = arith.constant dense<0.000000e+00> : vector<8x48xf32>
    %72 = tpu.matmul %70, %27, %cst_47 {dimension_numbers = #tpu.dot_dimension_numbers<[1], [0], [0], [1], [0, 0, 1, 1], [], []>} : vector<8x16xf32>, vector<16x48xf32>, vector<8x48xf32> -> vector<8x48xf32>
    %73 = vector.broadcast %30 : vector<1x48xf32> to vector<8x48xf32>
    %74 = arith.addf %72, %73 : vector<8x48xf32>
    %cst_48 = arith.constant dense<0.000000e+00> : vector<8x48xf32>
    %75 = tpu.matmul %71, %28, %cst_48 {dimension_numbers = #tpu.dot_dimension_numbers<[1], [0], [0], [1], [0, 0, 1, 1], [], []>} : vector<8x16xf32>, vector<16x48xf32>, vector<8x48xf32> -> vector<8x48xf32>
    %76 = vector.broadcast %31 : vector<1x48xf32> to vector<8x48xf32>
    %77 = arith.addf %75, %76 : vector<8x48xf32>
    %78 = vector.extract_strided_slice %41 {offsets = [0, 0], sizes = [8, 32], strides = [1, 1]} : vector<8x48xf32> to vector<8x32xf32>
    %79 = vector.extract_strided_slice %74 {offsets = [0, 0], sizes = [8, 32], strides = [1, 1]} : vector<8x48xf32> to vector<8x32xf32>
    %80 = arith.addf %78, %79 : vector<8x32xf32>
    %81 = arith.negf %80 : vector<8x32xf32>
    %82 = math.exp %81 : vector<8x32xf32>
    %cst_49 = arith.constant 1.000000e+00 : f32
    %83 = vector.broadcast %cst_49 : f32 to vector<8x32xf32>
    %84 = arith.addf %83, %82 : vector<8x32xf32>
    %85 = arith.divf %83, %84 : vector<8x32xf32>
    %86 = vector.extract_strided_slice %85 {offsets = [0, 0], sizes = [8, 16], strides = [1, 1]} : vector<8x32xf32> to vector<8x16xf32>
    %87 = vector.extract_strided_slice %85 {offsets = [0, 16], sizes = [8, 16], strides = [1, 1]} : vector<8x32xf32> to vector<8x16xf32>
    %88 = vector.extract_strided_slice %41 {offsets = [0, 32], sizes = [8, 16], strides = [1, 1]} : vector<8x48xf32> to vector<8x16xf32>
    %89 = vector.extract_strided_slice %74 {offsets = [0, 32], sizes = [8, 16], strides = [1, 1]} : vector<8x48xf32> to vector<8x16xf32>
    %90 = arith.mulf %86, %89 : vector<8x16xf32>
    %91 = arith.addf %88, %90 : vector<8x16xf32>
    %92 = math.tanh %91 : vector<8x16xf32>
    %cst_50 = arith.constant 1.000000e+00 : f32
    %93 = vector.broadcast %cst_50 : f32 to vector<8x16xf32>
    %94 = arith.subf %93, %87 : vector<8x16xf32>
    %95 = arith.mulf %94, %92 : vector<8x16xf32>
    %96 = arith.mulf %87, %70 : vector<8x16xf32>
    %97 = arith.addf %95, %96 : vector<8x16xf32>
    %cst_51 = arith.constant dense<0.000000e+00> : vector<8x48xf32>
    %98 = tpu.matmul %97, %29, %cst_51 {dimension_numbers = #tpu.dot_dimension_numbers<[1], [0], [0], [1], [0, 0, 1, 1], [], []>} : vector<8x16xf32>, vector<16x48xf32>, vector<8x48xf32> -> vector<8x48xf32>
    %99 = vector.broadcast %32 : vector<1x48xf32> to vector<8x48xf32>
    %100 = arith.addf %98, %99 : vector<8x48xf32>
    %101 = vector.extract_strided_slice %100 {offsets = [0, 0], sizes = [8, 32], strides = [1, 1]} : vector<8x48xf32> to vector<8x32xf32>
    %102 = vector.extract_strided_slice %77 {offsets = [0, 0], sizes = [8, 32], strides = [1, 1]} : vector<8x48xf32> to vector<8x32xf32>
    %103 = arith.addf %101, %102 : vector<8x32xf32>
    %104 = arith.negf %103 : vector<8x32xf32>
    %105 = math.exp %104 : vector<8x32xf32>
    %cst_52 = arith.constant 1.000000e+00 : f32
    %106 = vector.broadcast %cst_52 : f32 to vector<8x32xf32>
    %107 = arith.addf %106, %105 : vector<8x32xf32>
    %108 = arith.divf %106, %107 : vector<8x32xf32>
    %109 = vector.extract_strided_slice %108 {offsets = [0, 0], sizes = [8, 16], strides = [1, 1]} : vector<8x32xf32> to vector<8x16xf32>
    %110 = vector.extract_strided_slice %108 {offsets = [0, 16], sizes = [8, 16], strides = [1, 1]} : vector<8x32xf32> to vector<8x16xf32>
    %111 = vector.extract_strided_slice %100 {offsets = [0, 32], sizes = [8, 16], strides = [1, 1]} : vector<8x48xf32> to vector<8x16xf32>
    %112 = vector.extract_strided_slice %77 {offsets = [0, 32], sizes = [8, 16], strides = [1, 1]} : vector<8x48xf32> to vector<8x16xf32>
    %113 = arith.mulf %109, %112 : vector<8x16xf32>
    %114 = arith.addf %111, %113 : vector<8x16xf32>
    %115 = math.tanh %114 : vector<8x16xf32>
    %cst_53 = arith.constant 1.000000e+00 : f32
    %116 = vector.broadcast %cst_53 : f32 to vector<8x16xf32>
    %117 = arith.subf %116, %110 : vector<8x16xf32>
    %118 = arith.mulf %117, %115 : vector<8x16xf32>
    %119 = arith.mulf %110, %71 : vector<8x16xf32>
    %120 = arith.addf %118, %119 : vector<8x16xf32>
    %cst_54 = arith.constant dense<0.000000e+00> : vector<8x48xf32>
    %121 = tpu.matmul %97, %27, %cst_54 {dimension_numbers = #tpu.dot_dimension_numbers<[1], [0], [0], [1], [0, 0, 1, 1], [], []>} : vector<8x16xf32>, vector<16x48xf32>, vector<8x48xf32> -> vector<8x48xf32>
    %122 = vector.broadcast %30 : vector<1x48xf32> to vector<8x48xf32>
    %123 = arith.addf %121, %122 : vector<8x48xf32>
    %cst_55 = arith.constant dense<0.000000e+00> : vector<8x48xf32>
    %124 = tpu.matmul %120, %28, %cst_55 {dimension_numbers = #tpu.dot_dimension_numbers<[1], [0], [0], [1], [0, 0, 1, 1], [], []>} : vector<8x16xf32>, vector<16x48xf32>, vector<8x48xf32> -> vector<8x48xf32>
    %125 = vector.broadcast %31 : vector<1x48xf32> to vector<8x48xf32>
    %126 = arith.addf %124, %125 : vector<8x48xf32>
    %127 = vector.extract_strided_slice %45 {offsets = [0, 0], sizes = [8, 32], strides = [1, 1]} : vector<8x48xf32> to vector<8x32xf32>
    %128 = vector.extract_strided_slice %123 {offsets = [0, 0], sizes = [8, 32], strides = [1, 1]} : vector<8x48xf32> to vector<8x32xf32>
    %129 = arith.addf %127, %128 : vector<8x32xf32>
    %130 = arith.negf %129 : vector<8x32xf32>
    %131 = math.exp %130 : vector<8x32xf32>
    %cst_56 = arith.constant 1.000000e+00 : f32
    %132 = vector.broadcast %cst_56 : f32 to vector<8x32xf32>
    %133 = arith.addf %132, %131 : vector<8x32xf32>
    %134 = arith.divf %132, %133 : vector<8x32xf32>
    %135 = vector.extract_strided_slice %134 {offsets = [0, 0], sizes = [8, 16], strides = [1, 1]} : vector<8x32xf32> to vector<8x16xf32>
    %136 = vector.extract_strided_slice %134 {offsets = [0, 16], sizes = [8, 16], strides = [1, 1]} : vector<8x32xf32> to vector<8x16xf32>
    %137 = vector.extract_strided_slice %45 {offsets = [0, 32], sizes = [8, 16], strides = [1, 1]} : vector<8x48xf32> to vector<8x16xf32>
    %138 = vector.extract_strided_slice %123 {offsets = [0, 32], sizes = [8, 16], strides = [1, 1]} : vector<8x48xf32> to vector<8x16xf32>
    %139 = arith.mulf %135, %138 : vector<8x16xf32>
    %140 = arith.addf %137, %139 : vector<8x16xf32>
    %141 = math.tanh %140 : vector<8x16xf32>
    %cst_57 = arith.constant 1.000000e+00 : f32
    %142 = vector.broadcast %cst_57 : f32 to vector<8x16xf32>
    %143 = arith.subf %142, %136 : vector<8x16xf32>
    %144 = arith.mulf %143, %141 : vector<8x16xf32>
    %145 = arith.mulf %136, %97 : vector<8x16xf32>
    %146 = arith.addf %144, %145 : vector<8x16xf32>
    %cst_58 = arith.constant dense<0.000000e+00> : vector<8x48xf32>
    %147 = tpu.matmul %146, %29, %cst_58 {dimension_numbers = #tpu.dot_dimension_numbers<[1], [0], [0], [1], [0, 0, 1, 1], [], []>} : vector<8x16xf32>, vector<16x48xf32>, vector<8x48xf32> -> vector<8x48xf32>
    %148 = vector.broadcast %32 : vector<1x48xf32> to vector<8x48xf32>
    %149 = arith.addf %147, %148 : vector<8x48xf32>
    %150 = vector.extract_strided_slice %149 {offsets = [0, 0], sizes = [8, 32], strides = [1, 1]} : vector<8x48xf32> to vector<8x32xf32>
    %151 = vector.extract_strided_slice %126 {offsets = [0, 0], sizes = [8, 32], strides = [1, 1]} : vector<8x48xf32> to vector<8x32xf32>
    %152 = arith.addf %150, %151 : vector<8x32xf32>
    %153 = arith.negf %152 : vector<8x32xf32>
    %154 = math.exp %153 : vector<8x32xf32>
    %cst_59 = arith.constant 1.000000e+00 : f32
    %155 = vector.broadcast %cst_59 : f32 to vector<8x32xf32>
    %156 = arith.addf %155, %154 : vector<8x32xf32>
    %157 = arith.divf %155, %156 : vector<8x32xf32>
    %158 = vector.extract_strided_slice %157 {offsets = [0, 0], sizes = [8, 16], strides = [1, 1]} : vector<8x32xf32> to vector<8x16xf32>
    %159 = vector.extract_strided_slice %157 {offsets = [0, 16], sizes = [8, 16], strides = [1, 1]} : vector<8x32xf32> to vector<8x16xf32>
    %160 = vector.extract_strided_slice %149 {offsets = [0, 32], sizes = [8, 16], strides = [1, 1]} : vector<8x48xf32> to vector<8x16xf32>
    %161 = vector.extract_strided_slice %126 {offsets = [0, 32], sizes = [8, 16], strides = [1, 1]} : vector<8x48xf32> to vector<8x16xf32>
    %162 = arith.mulf %158, %161 : vector<8x16xf32>
    %163 = arith.addf %160, %162 : vector<8x16xf32>
    %164 = math.tanh %163 : vector<8x16xf32>
    %cst_60 = arith.constant 1.000000e+00 : f32
    %165 = vector.broadcast %cst_60 : f32 to vector<8x16xf32>
    %166 = arith.subf %165, %159 : vector<8x16xf32>
    %167 = arith.mulf %166, %164 : vector<8x16xf32>
    %168 = arith.mulf %159, %120 : vector<8x16xf32>
    %169 = arith.addf %167, %168 : vector<8x16xf32>
    %cst_61 = arith.constant dense<0.000000e+00> : vector<8x48xf32>
    %170 = tpu.matmul %146, %27, %cst_61 {dimension_numbers = #tpu.dot_dimension_numbers<[1], [0], [0], [1], [0, 0, 1, 1], [], []>} : vector<8x16xf32>, vector<16x48xf32>, vector<8x48xf32> -> vector<8x48xf32>
    %171 = vector.broadcast %30 : vector<1x48xf32> to vector<8x48xf32>
    %172 = arith.addf %170, %171 : vector<8x48xf32>
    %cst_62 = arith.constant dense<0.000000e+00> : vector<8x48xf32>
    %173 = tpu.matmul %169, %28, %cst_62 {dimension_numbers = #tpu.dot_dimension_numbers<[1], [0], [0], [1], [0, 0, 1, 1], [], []>} : vector<8x16xf32>, vector<16x48xf32>, vector<8x48xf32> -> vector<8x48xf32>
    %174 = vector.broadcast %31 : vector<1x48xf32> to vector<8x48xf32>
    %175 = arith.addf %173, %174 : vector<8x48xf32>
    %176 = vector.extract_strided_slice %49 {offsets = [0, 0], sizes = [8, 32], strides = [1, 1]} : vector<8x48xf32> to vector<8x32xf32>
    %177 = vector.extract_strided_slice %172 {offsets = [0, 0], sizes = [8, 32], strides = [1, 1]} : vector<8x48xf32> to vector<8x32xf32>
    %178 = arith.addf %176, %177 : vector<8x32xf32>
    %179 = arith.negf %178 : vector<8x32xf32>
    %180 = math.exp %179 : vector<8x32xf32>
    %cst_63 = arith.constant 1.000000e+00 : f32
    %181 = vector.broadcast %cst_63 : f32 to vector<8x32xf32>
    %182 = arith.addf %181, %180 : vector<8x32xf32>
    %183 = arith.divf %181, %182 : vector<8x32xf32>
    %184 = vector.extract_strided_slice %183 {offsets = [0, 0], sizes = [8, 16], strides = [1, 1]} : vector<8x32xf32> to vector<8x16xf32>
    %185 = vector.extract_strided_slice %183 {offsets = [0, 16], sizes = [8, 16], strides = [1, 1]} : vector<8x32xf32> to vector<8x16xf32>
    %186 = vector.extract_strided_slice %49 {offsets = [0, 32], sizes = [8, 16], strides = [1, 1]} : vector<8x48xf32> to vector<8x16xf32>
    %187 = vector.extract_strided_slice %172 {offsets = [0, 32], sizes = [8, 16], strides = [1, 1]} : vector<8x48xf32> to vector<8x16xf32>
    %188 = arith.mulf %184, %187 : vector<8x16xf32>
    %189 = arith.addf %186, %188 : vector<8x16xf32>
    %190 = math.tanh %189 : vector<8x16xf32>
    %cst_64 = arith.constant 1.000000e+00 : f32
    %191 = vector.broadcast %cst_64 : f32 to vector<8x16xf32>
    %192 = arith.subf %191, %185 : vector<8x16xf32>
    %193 = arith.mulf %192, %190 : vector<8x16xf32>
    %194 = arith.mulf %185, %146 : vector<8x16xf32>
    %195 = arith.addf %193, %194 : vector<8x16xf32>
    %cst_65 = arith.constant dense<0.000000e+00> : vector<8x48xf32>
    %196 = tpu.matmul %195, %29, %cst_65 {dimension_numbers = #tpu.dot_dimension_numbers<[1], [0], [0], [1], [0, 0, 1, 1], [], []>} : vector<8x16xf32>, vector<16x48xf32>, vector<8x48xf32> -> vector<8x48xf32>
    %197 = vector.broadcast %32 : vector<1x48xf32> to vector<8x48xf32>
    %198 = arith.addf %196, %197 : vector<8x48xf32>
    %199 = vector.extract_strided_slice %198 {offsets = [0, 0], sizes = [8, 32], strides = [1, 1]} : vector<8x48xf32> to vector<8x32xf32>
    %200 = vector.extract_strided_slice %175 {offsets = [0, 0], sizes = [8, 32], strides = [1, 1]} : vector<8x48xf32> to vector<8x32xf32>
    %201 = arith.addf %199, %200 : vector<8x32xf32>
    %202 = arith.negf %201 : vector<8x32xf32>
    %203 = math.exp %202 : vector<8x32xf32>
    %cst_66 = arith.constant 1.000000e+00 : f32
    %204 = vector.broadcast %cst_66 : f32 to vector<8x32xf32>
    %205 = arith.addf %204, %203 : vector<8x32xf32>
    %206 = arith.divf %204, %205 : vector<8x32xf32>
    %207 = vector.extract_strided_slice %206 {offsets = [0, 0], sizes = [8, 16], strides = [1, 1]} : vector<8x32xf32> to vector<8x16xf32>
    %208 = vector.extract_strided_slice %206 {offsets = [0, 16], sizes = [8, 16], strides = [1, 1]} : vector<8x32xf32> to vector<8x16xf32>
    %209 = vector.extract_strided_slice %198 {offsets = [0, 32], sizes = [8, 16], strides = [1, 1]} : vector<8x48xf32> to vector<8x16xf32>
    %210 = vector.extract_strided_slice %175 {offsets = [0, 32], sizes = [8, 16], strides = [1, 1]} : vector<8x48xf32> to vector<8x16xf32>
    %211 = arith.mulf %207, %210 : vector<8x16xf32>
    %212 = arith.addf %209, %211 : vector<8x16xf32>
    %213 = math.tanh %212 : vector<8x16xf32>
    %cst_67 = arith.constant 1.000000e+00 : f32
    %214 = vector.broadcast %cst_67 : f32 to vector<8x16xf32>
    %215 = arith.subf %214, %208 : vector<8x16xf32>
    %216 = arith.mulf %215, %213 : vector<8x16xf32>
    %217 = arith.mulf %208, %169 : vector<8x16xf32>
    %218 = arith.addf %216, %217 : vector<8x16xf32>
    %cst_68 = arith.constant dense<0.000000e+00> : vector<8x48xf32>
    %219 = tpu.matmul %195, %27, %cst_68 {dimension_numbers = #tpu.dot_dimension_numbers<[1], [0], [0], [1], [0, 0, 1, 1], [], []>} : vector<8x16xf32>, vector<16x48xf32>, vector<8x48xf32> -> vector<8x48xf32>
    %220 = vector.broadcast %30 : vector<1x48xf32> to vector<8x48xf32>
    %221 = arith.addf %219, %220 : vector<8x48xf32>
    %cst_69 = arith.constant dense<0.000000e+00> : vector<8x48xf32>
    %222 = tpu.matmul %218, %28, %cst_69 {dimension_numbers = #tpu.dot_dimension_numbers<[1], [0], [0], [1], [0, 0, 1, 1], [], []>} : vector<8x16xf32>, vector<16x48xf32>, vector<8x48xf32> -> vector<8x48xf32>
    %223 = vector.broadcast %31 : vector<1x48xf32> to vector<8x48xf32>
    %224 = arith.addf %222, %223 : vector<8x48xf32>
    %225 = vector.extract_strided_slice %53 {offsets = [0, 0], sizes = [8, 32], strides = [1, 1]} : vector<8x48xf32> to vector<8x32xf32>
    %226 = vector.extract_strided_slice %221 {offsets = [0, 0], sizes = [8, 32], strides = [1, 1]} : vector<8x48xf32> to vector<8x32xf32>
    %227 = arith.addf %225, %226 : vector<8x32xf32>
    %228 = arith.negf %227 : vector<8x32xf32>
    %229 = math.exp %228 : vector<8x32xf32>
    %cst_70 = arith.constant 1.000000e+00 : f32
    %230 = vector.broadcast %cst_70 : f32 to vector<8x32xf32>
    %231 = arith.addf %230, %229 : vector<8x32xf32>
    %232 = arith.divf %230, %231 : vector<8x32xf32>
    %233 = vector.extract_strided_slice %232 {offsets = [0, 0], sizes = [8, 16], strides = [1, 1]} : vector<8x32xf32> to vector<8x16xf32>
    %234 = vector.extract_strided_slice %232 {offsets = [0, 16], sizes = [8, 16], strides = [1, 1]} : vector<8x32xf32> to vector<8x16xf32>
    %235 = vector.extract_strided_slice %53 {offsets = [0, 32], sizes = [8, 16], strides = [1, 1]} : vector<8x48xf32> to vector<8x16xf32>
    %236 = vector.extract_strided_slice %221 {offsets = [0, 32], sizes = [8, 16], strides = [1, 1]} : vector<8x48xf32> to vector<8x16xf32>
    %237 = arith.mulf %233, %236 : vector<8x16xf32>
    %238 = arith.addf %235, %237 : vector<8x16xf32>
    %239 = math.tanh %238 : vector<8x16xf32>
    %cst_71 = arith.constant 1.000000e+00 : f32
    %240 = vector.broadcast %cst_71 : f32 to vector<8x16xf32>
    %241 = arith.subf %240, %234 : vector<8x16xf32>
    %242 = arith.mulf %241, %239 : vector<8x16xf32>
    %243 = arith.mulf %234, %195 : vector<8x16xf32>
    %244 = arith.addf %242, %243 : vector<8x16xf32>
    %cst_72 = arith.constant dense<0.000000e+00> : vector<8x48xf32>
    %245 = tpu.matmul %244, %29, %cst_72 {dimension_numbers = #tpu.dot_dimension_numbers<[1], [0], [0], [1], [0, 0, 1, 1], [], []>} : vector<8x16xf32>, vector<16x48xf32>, vector<8x48xf32> -> vector<8x48xf32>
    %246 = vector.broadcast %32 : vector<1x48xf32> to vector<8x48xf32>
    %247 = arith.addf %245, %246 : vector<8x48xf32>
    %248 = vector.extract_strided_slice %247 {offsets = [0, 0], sizes = [8, 32], strides = [1, 1]} : vector<8x48xf32> to vector<8x32xf32>
    %249 = vector.extract_strided_slice %224 {offsets = [0, 0], sizes = [8, 32], strides = [1, 1]} : vector<8x48xf32> to vector<8x32xf32>
    %250 = arith.addf %248, %249 : vector<8x32xf32>
    %251 = arith.negf %250 : vector<8x32xf32>
    %252 = math.exp %251 : vector<8x32xf32>
    %cst_73 = arith.constant 1.000000e+00 : f32
    %253 = vector.broadcast %cst_73 : f32 to vector<8x32xf32>
    %254 = arith.addf %253, %252 : vector<8x32xf32>
    %255 = arith.divf %253, %254 : vector<8x32xf32>
    %256 = vector.extract_strided_slice %255 {offsets = [0, 0], sizes = [8, 16], strides = [1, 1]} : vector<8x32xf32> to vector<8x16xf32>
    %257 = vector.extract_strided_slice %255 {offsets = [0, 16], sizes = [8, 16], strides = [1, 1]} : vector<8x32xf32> to vector<8x16xf32>
    %258 = vector.extract_strided_slice %247 {offsets = [0, 32], sizes = [8, 16], strides = [1, 1]} : vector<8x48xf32> to vector<8x16xf32>
    %259 = vector.extract_strided_slice %224 {offsets = [0, 32], sizes = [8, 16], strides = [1, 1]} : vector<8x48xf32> to vector<8x16xf32>
    %260 = arith.mulf %256, %259 : vector<8x16xf32>
    %261 = arith.addf %258, %260 : vector<8x16xf32>
    %262 = math.tanh %261 : vector<8x16xf32>
    %cst_74 = arith.constant 1.000000e+00 : f32
    %263 = vector.broadcast %cst_74 : f32 to vector<8x16xf32>
    %264 = arith.subf %263, %257 : vector<8x16xf32>
    %265 = arith.mulf %264, %262 : vector<8x16xf32>
    %266 = arith.mulf %257, %218 : vector<8x16xf32>
    %267 = arith.addf %265, %266 : vector<8x16xf32>
    %cst_75 = arith.constant dense<0.000000e+00> : vector<8x48xf32>
    %268 = tpu.matmul %244, %27, %cst_75 {dimension_numbers = #tpu.dot_dimension_numbers<[1], [0], [0], [1], [0, 0, 1, 1], [], []>} : vector<8x16xf32>, vector<16x48xf32>, vector<8x48xf32> -> vector<8x48xf32>
    %269 = vector.broadcast %30 : vector<1x48xf32> to vector<8x48xf32>
    %270 = arith.addf %268, %269 : vector<8x48xf32>
    %cst_76 = arith.constant dense<0.000000e+00> : vector<8x48xf32>
    %271 = tpu.matmul %267, %28, %cst_76 {dimension_numbers = #tpu.dot_dimension_numbers<[1], [0], [0], [1], [0, 0, 1, 1], [], []>} : vector<8x16xf32>, vector<16x48xf32>, vector<8x48xf32> -> vector<8x48xf32>
    %272 = vector.broadcast %31 : vector<1x48xf32> to vector<8x48xf32>
    %273 = arith.addf %271, %272 : vector<8x48xf32>
    %274 = vector.extract_strided_slice %57 {offsets = [0, 0], sizes = [8, 32], strides = [1, 1]} : vector<8x48xf32> to vector<8x32xf32>
    %275 = vector.extract_strided_slice %270 {offsets = [0, 0], sizes = [8, 32], strides = [1, 1]} : vector<8x48xf32> to vector<8x32xf32>
    %276 = arith.addf %274, %275 : vector<8x32xf32>
    %277 = arith.negf %276 : vector<8x32xf32>
    %278 = math.exp %277 : vector<8x32xf32>
    %cst_77 = arith.constant 1.000000e+00 : f32
    %279 = vector.broadcast %cst_77 : f32 to vector<8x32xf32>
    %280 = arith.addf %279, %278 : vector<8x32xf32>
    %281 = arith.divf %279, %280 : vector<8x32xf32>
    %282 = vector.extract_strided_slice %281 {offsets = [0, 0], sizes = [8, 16], strides = [1, 1]} : vector<8x32xf32> to vector<8x16xf32>
    %283 = vector.extract_strided_slice %281 {offsets = [0, 16], sizes = [8, 16], strides = [1, 1]} : vector<8x32xf32> to vector<8x16xf32>
    %284 = vector.extract_strided_slice %57 {offsets = [0, 32], sizes = [8, 16], strides = [1, 1]} : vector<8x48xf32> to vector<8x16xf32>
    %285 = vector.extract_strided_slice %270 {offsets = [0, 32], sizes = [8, 16], strides = [1, 1]} : vector<8x48xf32> to vector<8x16xf32>
    %286 = arith.mulf %282, %285 : vector<8x16xf32>
    %287 = arith.addf %284, %286 : vector<8x16xf32>
    %288 = math.tanh %287 : vector<8x16xf32>
    %cst_78 = arith.constant 1.000000e+00 : f32
    %289 = vector.broadcast %cst_78 : f32 to vector<8x16xf32>
    %290 = arith.subf %289, %283 : vector<8x16xf32>
    %291 = arith.mulf %290, %288 : vector<8x16xf32>
    %292 = arith.mulf %283, %244 : vector<8x16xf32>
    %293 = arith.addf %291, %292 : vector<8x16xf32>
    %cst_79 = arith.constant dense<0.000000e+00> : vector<8x48xf32>
    %294 = tpu.matmul %293, %29, %cst_79 {dimension_numbers = #tpu.dot_dimension_numbers<[1], [0], [0], [1], [0, 0, 1, 1], [], []>} : vector<8x16xf32>, vector<16x48xf32>, vector<8x48xf32> -> vector<8x48xf32>
    %295 = vector.broadcast %32 : vector<1x48xf32> to vector<8x48xf32>
    %296 = arith.addf %294, %295 : vector<8x48xf32>
    %297 = vector.extract_strided_slice %296 {offsets = [0, 0], sizes = [8, 32], strides = [1, 1]} : vector<8x48xf32> to vector<8x32xf32>
    %298 = vector.extract_strided_slice %273 {offsets = [0, 0], sizes = [8, 32], strides = [1, 1]} : vector<8x48xf32> to vector<8x32xf32>
    %299 = arith.addf %297, %298 : vector<8x32xf32>
    %300 = arith.negf %299 : vector<8x32xf32>
    %301 = math.exp %300 : vector<8x32xf32>
    %cst_80 = arith.constant 1.000000e+00 : f32
    %302 = vector.broadcast %cst_80 : f32 to vector<8x32xf32>
    %303 = arith.addf %302, %301 : vector<8x32xf32>
    %304 = arith.divf %302, %303 : vector<8x32xf32>
    %305 = vector.extract_strided_slice %304 {offsets = [0, 0], sizes = [8, 16], strides = [1, 1]} : vector<8x32xf32> to vector<8x16xf32>
    %306 = vector.extract_strided_slice %304 {offsets = [0, 16], sizes = [8, 16], strides = [1, 1]} : vector<8x32xf32> to vector<8x16xf32>
    %307 = vector.extract_strided_slice %296 {offsets = [0, 32], sizes = [8, 16], strides = [1, 1]} : vector<8x48xf32> to vector<8x16xf32>
    %308 = vector.extract_strided_slice %273 {offsets = [0, 32], sizes = [8, 16], strides = [1, 1]} : vector<8x48xf32> to vector<8x16xf32>
    %309 = arith.mulf %305, %308 : vector<8x16xf32>
    %310 = arith.addf %307, %309 : vector<8x16xf32>
    %311 = math.tanh %310 : vector<8x16xf32>
    %cst_81 = arith.constant 1.000000e+00 : f32
    %312 = vector.broadcast %cst_81 : f32 to vector<8x16xf32>
    %313 = arith.subf %312, %306 : vector<8x16xf32>
    %314 = arith.mulf %313, %311 : vector<8x16xf32>
    %315 = arith.mulf %306, %267 : vector<8x16xf32>
    %316 = arith.addf %314, %315 : vector<8x16xf32>
    %cst_82 = arith.constant dense<0.000000e+00> : vector<8x48xf32>
    %317 = tpu.matmul %293, %27, %cst_82 {dimension_numbers = #tpu.dot_dimension_numbers<[1], [0], [0], [1], [0, 0, 1, 1], [], []>} : vector<8x16xf32>, vector<16x48xf32>, vector<8x48xf32> -> vector<8x48xf32>
    %318 = vector.broadcast %30 : vector<1x48xf32> to vector<8x48xf32>
    %319 = arith.addf %317, %318 : vector<8x48xf32>
    %cst_83 = arith.constant dense<0.000000e+00> : vector<8x48xf32>
    %320 = tpu.matmul %316, %28, %cst_83 {dimension_numbers = #tpu.dot_dimension_numbers<[1], [0], [0], [1], [0, 0, 1, 1], [], []>} : vector<8x16xf32>, vector<16x48xf32>, vector<8x48xf32> -> vector<8x48xf32>
    %321 = vector.broadcast %31 : vector<1x48xf32> to vector<8x48xf32>
    %322 = arith.addf %320, %321 : vector<8x48xf32>
    %323 = vector.extract_strided_slice %61 {offsets = [0, 0], sizes = [8, 32], strides = [1, 1]} : vector<8x48xf32> to vector<8x32xf32>
    %324 = vector.extract_strided_slice %319 {offsets = [0, 0], sizes = [8, 32], strides = [1, 1]} : vector<8x48xf32> to vector<8x32xf32>
    %325 = arith.addf %323, %324 : vector<8x32xf32>
    %326 = arith.negf %325 : vector<8x32xf32>
    %327 = math.exp %326 : vector<8x32xf32>
    %cst_84 = arith.constant 1.000000e+00 : f32
    %328 = vector.broadcast %cst_84 : f32 to vector<8x32xf32>
    %329 = arith.addf %328, %327 : vector<8x32xf32>
    %330 = arith.divf %328, %329 : vector<8x32xf32>
    %331 = vector.extract_strided_slice %330 {offsets = [0, 0], sizes = [8, 16], strides = [1, 1]} : vector<8x32xf32> to vector<8x16xf32>
    %332 = vector.extract_strided_slice %330 {offsets = [0, 16], sizes = [8, 16], strides = [1, 1]} : vector<8x32xf32> to vector<8x16xf32>
    %333 = vector.extract_strided_slice %61 {offsets = [0, 32], sizes = [8, 16], strides = [1, 1]} : vector<8x48xf32> to vector<8x16xf32>
    %334 = vector.extract_strided_slice %319 {offsets = [0, 32], sizes = [8, 16], strides = [1, 1]} : vector<8x48xf32> to vector<8x16xf32>
    %335 = arith.mulf %331, %334 : vector<8x16xf32>
    %336 = arith.addf %333, %335 : vector<8x16xf32>
    %337 = math.tanh %336 : vector<8x16xf32>
    %cst_85 = arith.constant 1.000000e+00 : f32
    %338 = vector.broadcast %cst_85 : f32 to vector<8x16xf32>
    %339 = arith.subf %338, %332 : vector<8x16xf32>
    %340 = arith.mulf %339, %337 : vector<8x16xf32>
    %341 = arith.mulf %332, %293 : vector<8x16xf32>
    %342 = arith.addf %340, %341 : vector<8x16xf32>
    %cst_86 = arith.constant dense<0.000000e+00> : vector<8x48xf32>
    %343 = tpu.matmul %342, %29, %cst_86 {dimension_numbers = #tpu.dot_dimension_numbers<[1], [0], [0], [1], [0, 0, 1, 1], [], []>} : vector<8x16xf32>, vector<16x48xf32>, vector<8x48xf32> -> vector<8x48xf32>
    %344 = vector.broadcast %32 : vector<1x48xf32> to vector<8x48xf32>
    %345 = arith.addf %343, %344 : vector<8x48xf32>
    %346 = vector.extract_strided_slice %345 {offsets = [0, 0], sizes = [8, 32], strides = [1, 1]} : vector<8x48xf32> to vector<8x32xf32>
    %347 = vector.extract_strided_slice %322 {offsets = [0, 0], sizes = [8, 32], strides = [1, 1]} : vector<8x48xf32> to vector<8x32xf32>
    %348 = arith.addf %346, %347 : vector<8x32xf32>
    %349 = arith.negf %348 : vector<8x32xf32>
    %350 = math.exp %349 : vector<8x32xf32>
    %cst_87 = arith.constant 1.000000e+00 : f32
    %351 = vector.broadcast %cst_87 : f32 to vector<8x32xf32>
    %352 = arith.addf %351, %350 : vector<8x32xf32>
    %353 = arith.divf %351, %352 : vector<8x32xf32>
    %354 = vector.extract_strided_slice %353 {offsets = [0, 0], sizes = [8, 16], strides = [1, 1]} : vector<8x32xf32> to vector<8x16xf32>
    %355 = vector.extract_strided_slice %353 {offsets = [0, 16], sizes = [8, 16], strides = [1, 1]} : vector<8x32xf32> to vector<8x16xf32>
    %356 = vector.extract_strided_slice %345 {offsets = [0, 32], sizes = [8, 16], strides = [1, 1]} : vector<8x48xf32> to vector<8x16xf32>
    %357 = vector.extract_strided_slice %322 {offsets = [0, 32], sizes = [8, 16], strides = [1, 1]} : vector<8x48xf32> to vector<8x16xf32>
    %358 = arith.mulf %354, %357 : vector<8x16xf32>
    %359 = arith.addf %356, %358 : vector<8x16xf32>
    %360 = math.tanh %359 : vector<8x16xf32>
    %cst_88 = arith.constant 1.000000e+00 : f32
    %361 = vector.broadcast %cst_88 : f32 to vector<8x16xf32>
    %362 = arith.subf %361, %355 : vector<8x16xf32>
    %363 = arith.mulf %362, %360 : vector<8x16xf32>
    %364 = arith.mulf %355, %316 : vector<8x16xf32>
    %365 = arith.addf %363, %364 : vector<8x16xf32>
    %cst_89 = arith.constant dense<0.000000e+00> : vector<8x48xf32>
    %366 = tpu.matmul %342, %27, %cst_89 {dimension_numbers = #tpu.dot_dimension_numbers<[1], [0], [0], [1], [0, 0, 1, 1], [], []>} : vector<8x16xf32>, vector<16x48xf32>, vector<8x48xf32> -> vector<8x48xf32>
    %367 = vector.broadcast %30 : vector<1x48xf32> to vector<8x48xf32>
    %368 = arith.addf %366, %367 : vector<8x48xf32>
    %cst_90 = arith.constant dense<0.000000e+00> : vector<8x48xf32>
    %369 = tpu.matmul %365, %28, %cst_90 {dimension_numbers = #tpu.dot_dimension_numbers<[1], [0], [0], [1], [0, 0, 1, 1], [], []>} : vector<8x16xf32>, vector<16x48xf32>, vector<8x48xf32> -> vector<8x48xf32>
    %370 = vector.broadcast %31 : vector<1x48xf32> to vector<8x48xf32>
    %371 = arith.addf %369, %370 : vector<8x48xf32>
    %372 = vector.extract_strided_slice %65 {offsets = [0, 0], sizes = [8, 32], strides = [1, 1]} : vector<8x48xf32> to vector<8x32xf32>
    %373 = vector.extract_strided_slice %368 {offsets = [0, 0], sizes = [8, 32], strides = [1, 1]} : vector<8x48xf32> to vector<8x32xf32>
    %374 = arith.addf %372, %373 : vector<8x32xf32>
    %375 = arith.negf %374 : vector<8x32xf32>
    %376 = math.exp %375 : vector<8x32xf32>
    %cst_91 = arith.constant 1.000000e+00 : f32
    %377 = vector.broadcast %cst_91 : f32 to vector<8x32xf32>
    %378 = arith.addf %377, %376 : vector<8x32xf32>
    %379 = arith.divf %377, %378 : vector<8x32xf32>
    %380 = vector.extract_strided_slice %379 {offsets = [0, 0], sizes = [8, 16], strides = [1, 1]} : vector<8x32xf32> to vector<8x16xf32>
    %381 = vector.extract_strided_slice %379 {offsets = [0, 16], sizes = [8, 16], strides = [1, 1]} : vector<8x32xf32> to vector<8x16xf32>
    %382 = vector.extract_strided_slice %65 {offsets = [0, 32], sizes = [8, 16], strides = [1, 1]} : vector<8x48xf32> to vector<8x16xf32>
    %383 = vector.extract_strided_slice %368 {offsets = [0, 32], sizes = [8, 16], strides = [1, 1]} : vector<8x48xf32> to vector<8x16xf32>
    %384 = arith.mulf %380, %383 : vector<8x16xf32>
    %385 = arith.addf %382, %384 : vector<8x16xf32>
    %386 = math.tanh %385 : vector<8x16xf32>
    %cst_92 = arith.constant 1.000000e+00 : f32
    %387 = vector.broadcast %cst_92 : f32 to vector<8x16xf32>
    %388 = arith.subf %387, %381 : vector<8x16xf32>
    %389 = arith.mulf %388, %386 : vector<8x16xf32>
    %390 = arith.mulf %381, %342 : vector<8x16xf32>
    %391 = arith.addf %389, %390 : vector<8x16xf32>
    %cst_93 = arith.constant dense<0.000000e+00> : vector<8x48xf32>
    %392 = tpu.matmul %391, %29, %cst_93 {dimension_numbers = #tpu.dot_dimension_numbers<[1], [0], [0], [1], [0, 0, 1, 1], [], []>} : vector<8x16xf32>, vector<16x48xf32>, vector<8x48xf32> -> vector<8x48xf32>
    %393 = vector.broadcast %32 : vector<1x48xf32> to vector<8x48xf32>
    %394 = arith.addf %392, %393 : vector<8x48xf32>
    %395 = vector.extract_strided_slice %394 {offsets = [0, 0], sizes = [8, 32], strides = [1, 1]} : vector<8x48xf32> to vector<8x32xf32>
    %396 = vector.extract_strided_slice %371 {offsets = [0, 0], sizes = [8, 32], strides = [1, 1]} : vector<8x48xf32> to vector<8x32xf32>
    %397 = arith.addf %395, %396 : vector<8x32xf32>
    %398 = arith.negf %397 : vector<8x32xf32>
    %399 = math.exp %398 : vector<8x32xf32>
    %cst_94 = arith.constant 1.000000e+00 : f32
    %400 = vector.broadcast %cst_94 : f32 to vector<8x32xf32>
    %401 = arith.addf %400, %399 : vector<8x32xf32>
    %402 = arith.divf %400, %401 : vector<8x32xf32>
    %403 = vector.extract_strided_slice %402 {offsets = [0, 0], sizes = [8, 16], strides = [1, 1]} : vector<8x32xf32> to vector<8x16xf32>
    %404 = vector.extract_strided_slice %402 {offsets = [0, 16], sizes = [8, 16], strides = [1, 1]} : vector<8x32xf32> to vector<8x16xf32>
    %405 = vector.extract_strided_slice %394 {offsets = [0, 32], sizes = [8, 16], strides = [1, 1]} : vector<8x48xf32> to vector<8x16xf32>
    %406 = vector.extract_strided_slice %371 {offsets = [0, 32], sizes = [8, 16], strides = [1, 1]} : vector<8x48xf32> to vector<8x16xf32>
    %407 = arith.mulf %403, %406 : vector<8x16xf32>
    %408 = arith.addf %405, %407 : vector<8x16xf32>
    %409 = math.tanh %408 : vector<8x16xf32>
    %cst_95 = arith.constant 1.000000e+00 : f32
    %410 = vector.broadcast %cst_95 : f32 to vector<8x16xf32>
    %411 = arith.subf %410, %404 : vector<8x16xf32>
    %412 = arith.mulf %411, %409 : vector<8x16xf32>
    %413 = arith.mulf %404, %365 : vector<8x16xf32>
    %414 = arith.addf %412, %413 : vector<8x16xf32>
    %cst_96 = arith.constant dense<0.000000e+00> : vector<8x48xf32>
    %415 = tpu.matmul %391, %27, %cst_96 {dimension_numbers = #tpu.dot_dimension_numbers<[1], [0], [0], [1], [0, 0, 1, 1], [], []>} : vector<8x16xf32>, vector<16x48xf32>, vector<8x48xf32> -> vector<8x48xf32>
    %416 = vector.broadcast %30 : vector<1x48xf32> to vector<8x48xf32>
    %417 = arith.addf %415, %416 : vector<8x48xf32>
    %cst_97 = arith.constant dense<0.000000e+00> : vector<8x48xf32>
    %418 = tpu.matmul %414, %28, %cst_97 {dimension_numbers = #tpu.dot_dimension_numbers<[1], [0], [0], [1], [0, 0, 1, 1], [], []>} : vector<8x16xf32>, vector<16x48xf32>, vector<8x48xf32> -> vector<8x48xf32>
    %419 = vector.broadcast %31 : vector<1x48xf32> to vector<8x48xf32>
    %420 = arith.addf %418, %419 : vector<8x48xf32>
    %421 = vector.extract_strided_slice %69 {offsets = [0, 0], sizes = [8, 32], strides = [1, 1]} : vector<8x48xf32> to vector<8x32xf32>
    %422 = vector.extract_strided_slice %417 {offsets = [0, 0], sizes = [8, 32], strides = [1, 1]} : vector<8x48xf32> to vector<8x32xf32>
    %423 = arith.addf %421, %422 : vector<8x32xf32>
    %424 = arith.negf %423 : vector<8x32xf32>
    %425 = math.exp %424 : vector<8x32xf32>
    %cst_98 = arith.constant 1.000000e+00 : f32
    %426 = vector.broadcast %cst_98 : f32 to vector<8x32xf32>
    %427 = arith.addf %426, %425 : vector<8x32xf32>
    %428 = arith.divf %426, %427 : vector<8x32xf32>
    %429 = vector.extract_strided_slice %428 {offsets = [0, 0], sizes = [8, 16], strides = [1, 1]} : vector<8x32xf32> to vector<8x16xf32>
    %430 = vector.extract_strided_slice %428 {offsets = [0, 16], sizes = [8, 16], strides = [1, 1]} : vector<8x32xf32> to vector<8x16xf32>
    %431 = vector.extract_strided_slice %69 {offsets = [0, 32], sizes = [8, 16], strides = [1, 1]} : vector<8x48xf32> to vector<8x16xf32>
    %432 = vector.extract_strided_slice %417 {offsets = [0, 32], sizes = [8, 16], strides = [1, 1]} : vector<8x48xf32> to vector<8x16xf32>
    %433 = arith.mulf %429, %432 : vector<8x16xf32>
    %434 = arith.addf %431, %433 : vector<8x16xf32>
    %435 = math.tanh %434 : vector<8x16xf32>
    %cst_99 = arith.constant 1.000000e+00 : f32
    %436 = vector.broadcast %cst_99 : f32 to vector<8x16xf32>
    %437 = arith.subf %436, %430 : vector<8x16xf32>
    %438 = arith.mulf %437, %435 : vector<8x16xf32>
    %439 = arith.mulf %430, %391 : vector<8x16xf32>
    %440 = arith.addf %438, %439 : vector<8x16xf32>
    %cst_100 = arith.constant dense<0.000000e+00> : vector<8x48xf32>
    %441 = tpu.matmul %440, %29, %cst_100 {dimension_numbers = #tpu.dot_dimension_numbers<[1], [0], [0], [1], [0, 0, 1, 1], [], []>} : vector<8x16xf32>, vector<16x48xf32>, vector<8x48xf32> -> vector<8x48xf32>
    %442 = vector.broadcast %32 : vector<1x48xf32> to vector<8x48xf32>
    %443 = arith.addf %441, %442 : vector<8x48xf32>
    %444 = vector.extract_strided_slice %443 {offsets = [0, 0], sizes = [8, 32], strides = [1, 1]} : vector<8x48xf32> to vector<8x32xf32>
    %445 = vector.extract_strided_slice %420 {offsets = [0, 0], sizes = [8, 32], strides = [1, 1]} : vector<8x48xf32> to vector<8x32xf32>
    %446 = arith.addf %444, %445 : vector<8x32xf32>
    %447 = arith.negf %446 : vector<8x32xf32>
    %448 = math.exp %447 : vector<8x32xf32>
    %cst_101 = arith.constant 1.000000e+00 : f32
    %449 = vector.broadcast %cst_101 : f32 to vector<8x32xf32>
    %450 = arith.addf %449, %448 : vector<8x32xf32>
    %451 = arith.divf %449, %450 : vector<8x32xf32>
    %452 = vector.extract_strided_slice %451 {offsets = [0, 0], sizes = [8, 16], strides = [1, 1]} : vector<8x32xf32> to vector<8x16xf32>
    %453 = vector.extract_strided_slice %451 {offsets = [0, 16], sizes = [8, 16], strides = [1, 1]} : vector<8x32xf32> to vector<8x16xf32>
    %454 = vector.extract_strided_slice %443 {offsets = [0, 32], sizes = [8, 16], strides = [1, 1]} : vector<8x48xf32> to vector<8x16xf32>
    %455 = vector.extract_strided_slice %420 {offsets = [0, 32], sizes = [8, 16], strides = [1, 1]} : vector<8x48xf32> to vector<8x16xf32>
    %456 = arith.mulf %452, %455 : vector<8x16xf32>
    %457 = arith.addf %454, %456 : vector<8x16xf32>
    %458 = math.tanh %457 : vector<8x16xf32>
    %cst_102 = arith.constant 1.000000e+00 : f32
    %459 = vector.broadcast %cst_102 : f32 to vector<8x16xf32>
    %460 = arith.subf %459, %453 : vector<8x16xf32>
    %461 = arith.mulf %460, %458 : vector<8x16xf32>
    %462 = arith.mulf %453, %414 : vector<8x16xf32>
    %463 = arith.addf %461, %462 : vector<8x16xf32>
    %c144 = arith.constant 144 : index
    %c0_103 = arith.constant 0 : index
    %464 = vector.load %arg1[%c144, %c0_103] : memref<216x128xf32, #tpu.memory_space<vmem>>, vector<16x16xf32>
    %cst_104 = arith.constant dense<0.000000e+00> : vector<8x16xf32>
    %465 = tpu.matmul %463, %464, %cst_104 {dimension_numbers = #tpu.dot_dimension_numbers<[1], [0], [0], [1], [0, 0, 1, 1], [], []>} : vector<8x16xf32>, vector<16x16xf32>, vector<8x16xf32> -> vector<8x16xf32>
    %c160 = arith.constant 160 : index
    %c0_105 = arith.constant 0 : index
    %466 = vector.load %arg1[%c160, %c0_105] : memref<216x128xf32, #tpu.memory_space<vmem>>, vector<1x16xf32>
    %467 = vector.broadcast %466 : vector<1x16xf32> to vector<8x16xf32>
    %468 = arith.addf %465, %467 : vector<8x16xf32>
    %cst_106 = arith.constant 0.000000e+00 : f32
    %469 = vector.broadcast %cst_106 : f32 to vector<8x16xf32>
    %470 = arith.maximumf %468, %469 : vector<8x16xf32>
    %c168 = arith.constant 168 : index
    %c0_107 = arith.constant 0 : index
    %471 = vector.load %arg1[%c168, %c0_107] : memref<216x128xf32, #tpu.memory_space<vmem>>, vector<16x16xf32>
    %cst_108 = arith.constant dense<0.000000e+00> : vector<8x16xf32>
    %472 = tpu.matmul %470, %471, %cst_108 {dimension_numbers = #tpu.dot_dimension_numbers<[1], [0], [0], [1], [0, 0, 1, 1], [], []>} : vector<8x16xf32>, vector<16x16xf32>, vector<8x16xf32> -> vector<8x16xf32>
    %c184 = arith.constant 184 : index
    %c0_109 = arith.constant 0 : index
    %473 = vector.load %arg1[%c184, %c0_109] : memref<216x128xf32, #tpu.memory_space<vmem>>, vector<1x16xf32>
    %474 = vector.broadcast %473 : vector<1x16xf32> to vector<8x16xf32>
    %475 = arith.addf %472, %474 : vector<8x16xf32>
    %cst_110 = arith.constant 0.000000e+00 : f32
    %476 = vector.broadcast %cst_110 : f32 to vector<8x16xf32>
    %477 = arith.maximumf %475, %476 : vector<8x16xf32>
    %c192 = arith.constant 192 : index
    %c0_111 = arith.constant 0 : index
    %478 = vector.load %arg1[%c192, %c0_111] : memref<216x128xf32, #tpu.memory_space<vmem>>, vector<16x1xf32>
    %cst_112 = arith.constant dense<0.000000e+00> : vector<8x1xf32>
    %479 = tpu.matmul %477, %478, %cst_112 {dimension_numbers = #tpu.dot_dimension_numbers<[1], [0], [0], [1], [0, 0, 1, 1], [], []>} : vector<8x16xf32>, vector<16x1xf32>, vector<8x1xf32> -> vector<8x1xf32>
    %c208 = arith.constant 208 : index
    %c0_113 = arith.constant 0 : index
    %480 = vector.load %arg1[%c208, %c0_113] : memref<216x128xf32, #tpu.memory_space<vmem>>, vector<1x1xf32>
    %481 = vector.broadcast %480 : vector<1x1xf32> to vector<8x1xf32>
    %482 = arith.addf %479, %481 : vector<8x1xf32>
    %cst_114 = arith.constant 0.000000e+00 : f32
    %483 = vector.broadcast %cst_114 : f32 to vector<8x128xf32>
    %c0_115 = arith.constant 0 : index
    %c0_116 = arith.constant 0 : index
    %484 = vector.load %arg4[%c0_115, %c0_116] : memref<8x128xf32, #tpu.memory_space<vmem>>, vector<8x128xf32>
    tpu.vector_store %arg4[%c0_115, %c0_116], %483 {strides = array<i32>} : memref<8x128xf32, #tpu.memory_space<vmem>>, vector<8x128xf32>,
    %c0_117 = arith.constant 0 : index
    %c0_118 = arith.constant 0 : index
    %485 = vector.load %arg4[%c0_117, %c0_118] : memref<8x128xf32, #tpu.memory_space<vmem>>, vector<8x1xf32>
    tpu.vector_store %arg4[%c0_117, %c0_118], %482 {strides = array<i32>} : memref<8x128xf32, #tpu.memory_space<vmem>>, vector<8x1xf32>,
    %c0_119 = arith.constant 0 : index
    %c32_120 = arith.constant 32 : index
    %486 = vector.load %arg4[%c0_119, %c32_120] : memref<8x128xf32, #tpu.memory_space<vmem>>, vector<8x16xf32>
    tpu.vector_store %arg4[%c0_119, %c32_120], %477 {strides = array<i32>} : memref<8x128xf32, #tpu.memory_space<vmem>>, vector<8x16xf32>,
    %c0_121 = arith.constant 0 : index
    %c64_122 = arith.constant 64 : index
    %487 = vector.load %arg4[%c0_121, %c64_122] : memref<8x128xf32, #tpu.memory_space<vmem>>, vector<8x8xf32>
    tpu.vector_store %arg4[%c0_121, %c64_122], %25 {strides = array<i32>} : memref<8x128xf32, #tpu.memory_space<vmem>>, vector<8x8xf32>,
    %c0_123 = arith.constant 0 : index
    %c96_124 = arith.constant 96 : index
    %488 = vector.load %arg4[%c0_123, %c96_124] : memref<8x128xf32, #tpu.memory_space<vmem>>, vector<8x16xf32>
    tpu.vector_store %arg4[%c0_123, %c96_124], %10 {strides = array<i32>} : memref<8x128xf32, #tpu.memory_space<vmem>>, vector<8x16xf32>,
    return
  }
  func.func @transform_0(%arg0: i32) -> (i32, i32) {
    %c0_i32 = arith.constant 0 : i32
    %c0_i32_0 = arith.constant 0 : i32
    %c0_i32_1 = arith.constant 0 : i32
    return %c0_i32, %c0_i32_0 : i32, i32
  }
  func.func @transform_1(%arg0: i32) -> (i32, i32) {
    %c0_i32 = arith.constant 0 : i32
    %c0_i32_0 = arith.constant 0 : i32
    return %arg0, %c0_i32 : i32, i32
  }
  func.func @transform_2(%arg0: i32) -> (i32, i32, i32) {
    %c0_i32 = arith.constant 0 : i32
    %c0_i32_0 = arith.constant 0 : i32
    %c0_i32_1 = arith.constant 0 : i32
    return %c0_i32, %arg0, %c0_i32_0 : i32, i32, i32
  }
  func.func @transform_3(%arg0: i32) -> (i32, i32) {
    %c0_i32 = arith.constant 0 : i32
    %c0_i32_0 = arith.constant 0 : i32
    return %arg0, %c0_i32 : i32, i32
  }
}

</mosaic_0001>

<bundles_post_ra>
// kernel: _lambda_.1
= control target key start
LH: loop header
LB: loop body
LE: loop exit
PB: predicated region body
PF: predicated region fallthrough
CT: control target
= control target key end

     0   :  { %8 = vsyncpa [#allocation3], 0  ;;  %s4016_s12 = smov [#allocation2]   ;;  %s4478_s0 = inlined_call_operand.hbm [shape: f32[216,128], index: 0, kind: input, shape index: {}]   ;;  %s4479_s1 = inlined_call_operand.vmem [shape: f32[8,8], index: 1, kind: input, shape index: {}]   ;;  %s4480_s2 = inlined_call_operand.vmem [shape: f32[8,8,4], index: 2, kind: input, shape index: {}]   ;;  %s4481_s3 = inlined_call_operand.vmem [shape: f32[8,128], index: 3, kind: output, shape index: {}]  }
   0x1   :  { %s14_s13 = sshll.u32 %s4016_s12, 4  ;;  %s3992_s16 = scalar_lea.hbm %s4478_s0, 3456  ;;  %s15_s13 = int_to_ptr.vmem [resolvable:$true] %s14_s13 }
   0x2   :  { %p3993_p0 = scmp.ne.s32.totalorder %s4478_s0, %s3992_s16  ;;  %p3996_p1 = scmp.lt.u32.totalorder %s3992_s16, %s4478_s0 }
   0x4   :  { %p3998_p2 = pnand %p3996_p1, %p3993_p0 }
   0x6   :  { %4001 = shalt.err (!%p3998_p2)
}
   0x7   :  { %s4002_s21 = scalar_lea.vmem %s15_s13, 3456  ;;  %p4007_p4 = scmp.lt.s32.totalorder %s15_s13, %s15_s13 }
   0x8   :  { %p4003_p3 = scmp.ne.s32.totalorder %s15_s13, %s4002_s21  ;;  %p4008_p5 = scmp.lt.s32.totalorder %s4002_s21, %s4002_s21 }
   0xa   :  { %p4009_p6 = por %p4008_p5, %p4007_p4 }
   0xc   :  { %p4010_p7 = pnand %p4009_p6, %p4003_p3 }
   0xe   :  { %4013 = shalt.err (!%p4010_p7)
}
   0xf   :  { %s4017_s22 = smov 128   ;;  %s4018_s23 = smov 8  }
  0x10   :  { %20 = dma.hbm_to_vmem [thread:$0]  %s4478_s0, 3456, %s15_s13, [#allocation3], %s4017_s22, %s4017_s22, %s4018_s23  }
  0x11   :  { %4014 = dma.done.wait [#allocation3], 3456  }
  0x12   :  { %4015 = vsyncadd [#allocation3], 4294963840  ;;  %v4019_v0 = vmov 0.0   ;;  %vm4020_vm0 = vmmov 0   ;;  %vm35_vm1 = vcmask 64512   ;;  %v29_v1 = vld [vmem:[#allocation2] sm:$0xff] }
  0x13   :  { %3542 = vmatprep.subr.mxu0 %v4019_v0  ;;  %3336 = vst [vmem:[%s4481_s3] sm:$0xff] %v4019_v0  ;;  %3544 = vmatprep.mubr.msk.f32.mxu0 %vm4020_vm0, %v4019_v0  ;;  %v28_v2 = vld [vmem:[%s4479_s1] sm:$0xff]  ;;  %v115_v3 = vld [vmem:[#allocation2 + $0x10] sm:$0xff]  ;;  %v116_v4 = vld [vmem:[#allocation2 + $0x18] sm:$0xff]  ;;  %v4021_v6 = vmov 0.0|0.0   ;;  %vm122_vm2 = vcmask 130048   ;;  %vm299_vm3 = vcmask 1043456  }
  0x14   :  { %3551 = vmatprep.mubr.msk.f32.mxu1 %vm4020_vm0, %v4019_v0  ;;  %3543 = vmatpush3.msra.mxu0 %v29_v1  ;;  %v217_v5 = vld [vmem:[#allocation2 + $0x28] sm:$0xff]  ;;  %v3791_v7 = vpack.c.bf16 %v116_v4, %v115_v3  ;;  %v218_v8 = vld [vmem:[#allocation2 + $0x30] sm:$0xff]  ;;  %v207_v17 = vld [vmem:[#allocation2 + $0x38] sm:$0xf]  ;;  %vm295_vm4 = vcmask 31744   ;;  %s4023_s17 = smov 32  }
  0x15   :  { %3545 = vmatmul.mubr.msk.f32.vlgmr.msra.gmra.mrb[0].mxu0 %vm35_vm1, %v28_v2  ;;  %3790 = vmatprep.subr.bf16.mxu1 %v4021_v6  ;;  %v3794_v9 = vpack.c.bf16 %v218_v8, %v217_v5  ;;  %v3360_v10 = vld [vmem:[#allocation2 + $0x8] ss:$0 sm:$0xff]  ;;  %v294_v19 = vld [vmem:[%s4480_s2] sm:$0xff]  ;;  %v3372_v21 = vld [vmem:[%s4480_s2 + $0x10] sm:$0xff]  ;;  %s4024_s18 = smov 112   ;;  %s4025_s21 = smov 64  }
  0x16   :  { %3558 = vmatprep.mubr.msk.f32.mxu0 %vm4020_vm0, %v4019_v0  ;;  %3793 = vmatprep.subr.bf16.mxu0 %v4021_v6  ;;  %v3369_v20 = vld [vmem:[%s4480_s2 + $0x8] sm:$0xff]  ;;  %v3375_v22 = vld [vmem:[%s4480_s2 + $0x18] sm:$0xff]  ;;  %v3378_v23 = vld [vmem:[%s4480_s2 + $0x20] sm:$0xff]  ;;  %vm3337_vm5 = vcmask 7168   ;;  %vm3342_vm6 = vcmask 392448   ;;  %vm3348_vm7 = vcmask 589312  }
  0x17   :  { %3792 = vmatpush3.bf16.msra.mxu1 %v3791_v7  ;;  %3795 = vmatpush3.bf16.msra.mxu0 %v3794_v9  ;;  %v3381_v24 = vld [vmem:[%s4480_s2 + $0x28] sm:$0xff]  ;;  %v209_v26 = vld [vmem:[#allocation2 + $0x50] sm:$0xff]  ;;  %v3387_v28 = vld [vmem:[%s4480_s2 + $0x38] sm:$0xff]  ;;  %vm3353_vm8 = vcmask 917248  }
  0x18   :  { %3561 = vmatprep.subr.mxu1 %v4019_v0  ;;  %3566 = vmatprep.subr.mxu0 %v4019_v0  ;;  %v208_v25 = vld [vmem:[#allocation2 + $0x48] sm:$0xff]  ;;  %v3384_v27 = vld [vmem:[%s4480_s2 + $0x30] sm:$0xff]  ;;  %v3365_v31 = vld [vmem:[#allocation2 + $0x40] ss:$0 sm:$0xff]  ;;  %s4022_s2 = smov 96  }
  0x19   :  { %v4140_v29 = vpack.c.bf16 %v209_v26, %v208_v25  ;;  %v4174_v60 = vld [vmem:[#allocation2 + $0x58] ss:$0 sm:$0xff] }
  0xe8   :  { %v105_v11 = vpop.f32.mrb[0].mxu0 }
  0xe9   :  { %v106_v12 = vadd.f32 %v3360_v10, %v105_v11  ;;  %v3546_v13 = vpop.f32.mrb[1].mxu0  ;;  %v210_v11 = vld [vmem:[#allocation2 + $0x70] sm:$0xff] }
  0xea   :  { %v212_v13 = vld [vmem:[#allocation2 + $0x60] sm:$0xff] }
  0xeb   :  { %v3362_v14 = vmul.f32 -1.442695, %v106_v12  ;;  %v211_v12 = vld [vmem:[#allocation2 + $0x78] sm:$0xff] }
  0xed   :  { %3887 = vpow2.f32 %v3362_v14  ;;  %v4179_v14 = vpack.c.bf16 %v211_v12, %v210_v11 }
  0xf7   :  { %v3888_v15 = vpop.eup %3887 }
  0xf8   :  { %v112_v16 = vadd.f32 1.0, %v3888_v15  ;;  %v213_v15 = vld [vmem:[#allocation2 + $0x68] sm:$0xff] }
  0xfa   :  { %3889 = vrcp.f32 %v112_v16  ;;  %v4181_v16 = vpack.c.bf16 %v213_v15, %v212_v13 }
 0x104   :  { %v4077_v18 = vpop.eup %3889 }
 0x105   :  { %3552 = vmatmul.mubr.msk.f32.vlgmr.msra.gmra.mrb[0].mxu1 %vm122_vm2, %v4077_v18  ;;  %3559 = vmatmul.mubr.msk.f32.vlgmr.msra.gmra.mrb[2].mxu0 %vm122_vm2, %v4077_v18 }
 0x106   :  { %3562 = vmatpush3.msk.msra.mxu1 %vm299_vm3, %v207_v17  ;;  %3563 = vmatprep.mubr.msk.f32.mxu1 %vm4020_vm0, %v4019_v0 }
 0x107   :  { %3567 = vmatpush3.msk.msra.mxu0 %vm299_vm3, %v207_v17  ;;  %3568 = vmatprep.mubr.msk.f32.mxu0 %vm4020_vm0, %v4019_v0 }
 0x108   :  { %3571 = vmatprep.subr.mxu1 %v4019_v0  ;;  %3576 = vmatprep.subr.mxu0 %v4019_v0 }
 0x109   :  { %3564 = vmatmul.mubr.msk.f32.vlgmr.msra.gmra.mrb[2].mxu1 %vm295_vm4, %v294_v19  ;;  %3569 = vmatmul.mubr.msk.f32.vlgmr.msra.gmra.mrb[4].mxu0 %vm295_vm4, %v3369_v20 }
 0x10a   :  { %3572 = vmatpush3.msk.msra.mxu1 %vm299_vm3, %v207_v17  ;;  %3573 = vmatprep.mubr.msk.f32.mxu1 %vm4020_vm0, %v4019_v0 }
 0x10b   :  { %3577 = vmatpush3.msk.msra.mxu0 %vm299_vm3, %v207_v17  ;;  %3578 = vmatprep.mubr.msk.f32.mxu0 %vm4020_vm0, %v4019_v0 }
 0x10c   :  { %3581 = vmatprep.subr.mxu1 %v4019_v0  ;;  %3586 = vmatprep.subr.mxu0 %v4019_v0 }
 0x10d   :  { %3574 = vmatmul.mubr.msk.f32.vlgmr.msra.gmra.mrb[4].mxu1 %vm295_vm4, %v3372_v21  ;;  %3579 = vmatmul.mubr.msk.f32.vlgmr.msra.gmra.mrb[6].mxu0 %vm295_vm4, %v3375_v22 }
 0x10e   :  { %3582 = vmatpush3.msk.msra.mxu1 %vm299_vm3, %v207_v17  ;;  %3583 = vmatprep.mubr.msk.f32.mxu1 %vm4020_vm0, %v4019_v0 }
 0x10f   :  { %3587 = vmatpush3.msk.msra.mxu0 %vm299_vm3, %v207_v17  ;;  %3588 = vmatprep.mubr.msk.f32.mxu0 %vm4020_vm0, %v4019_v0 }
 0x110   :  { %3591 = vmatprep.subr.mxu1 %v4019_v0  ;;  %3596 = vmatprep.subr.mxu0 %v4019_v0 }
 0x111   :  { %3584 = vmatmul.mubr.msk.f32.vlgmr.msra.gmra.mrb[6].mxu1 %vm295_vm4, %v3378_v23  ;;  %3589 = vmatmul.mubr.msk.f32.vlgmr.msra.gmra.mrb[8].mxu0 %vm295_vm4, %v3381_v24  ;;  %v4194_v24 = vld [vmem:[#allocation2 + $0x88] ss:$0 sm:$0xff] }
 0x112   :  { %3592 = vmatpush3.msk.msra.mxu1 %vm299_vm3, %v207_v17  ;;  %3593 = vmatprep.mubr.msk.f32.mxu1 %vm4020_vm0, %v4019_v0 }
 0x113   :  { %3597 = vmatpush3.msk.msra.mxu0 %vm299_vm3, %v207_v17  ;;  %3598 = vmatprep.mubr.msk.f32.mxu0 %vm4020_vm0, %v4019_v0 }
 0x114   :  { %3796 = vmatprep.subr.bf16.mxu1 %v4021_v6  ;;  %3799 = vmatprep.subr.bf16.mxu0 %v4021_v6 }
 0x115   :  { %3594 = vmatmul.mubr.msk.f32.vlgmr.msra.gmra.mrb[8].mxu1 %vm295_vm4, %v3384_v27  ;;  %3599 = vmatmul.mubr.msk.f32.vlgmr.msra.gmra.mrb[10].mxu0 %vm295_vm4, %v3387_v28 }
 0x116   :  { %3798 = vmatpush3.bf16.msra.mxu1 %v4140_v29  ;;  %3605 = vmatprep.mubr.msk.f32.mxu1 %vm4020_vm0, %v4019_v0 }
 0x117   :  { %3612 = vmatprep.mubr.msk.f32.mxu0 %vm4020_vm0, %v4019_v0  ;;  %3802 = vmatprep.subr.bf16.mxu1 %v4021_v6 }
 0x118   :  { %3801 = vmatpush3.bf16.msra.mxu0 %v4179_v14 }
 0x119   :  { %3606 = vmatmul.mubr.f32.vlgmr.msra.gmra.mrb[10].mxu1 %v4019_v0  ;;  %3805 = vmatprep.subr.bf16.mxu0 %v4021_v6 }
 0x11a   :  { %3619 = vmatprep.mubr.msk.f32.mxu1 %vm4020_vm0, %v4019_v0  ;;  %3804 = vmatpush3.bf16.msra.mxu1 %v4181_v16 }
 0x11b   :  { %3808 = vmatprep.subr.bf16.mxu1 %v4021_v6  ;;  %3613 = vmatmul.mubr.f32.vlgmr.msra.gmra.mrb[12].mxu0 %v4019_v0 }
 0x11c   :  { %3807 = vmatpush3.bf16.msra.mxu0 %v4140_v29  ;;  %3626 = vmatprep.mubr.msk.f32.mxu0 %vm4020_vm0, %v4019_v0 }
 0x11d   :  { %3811 = vmatprep.subr.bf16.mxu0 %v4021_v6 }
 0x1d8   :  { %v4158_v30 = vpop.f32.mrb[0].mxu1  ;;  %v290_v32 = vpop.f32.mrb[2].mxu0 }
 0x1d9   :  { %v3553_v33 = vpop.f32.mrb[1].mxu1  ;;  %v3560_v34 = vpop.f32.mrb[3].mxu0  ;;  %v291_v35 = vadd.f32 %v3365_v31, %v290_v32  ;;  %v4208_v31 = vld [vmem:[#allocation2 + $0x80] ss:$0 sm:$0xff] }
 0x1dc   :  { %v369_v36 = vpop.f32.mrb[2].mxu1  ;;  %v445_v37 = vpop.f32.mrb[4].mxu0 }
 0x1dd   :  { %v373_v38 = vadd.f32 %v369_v36, %v291_v35  ;;  %v4160_v39 = vadd.f32 %v445_v37, %v291_v35  ;;  %v3565_v40 = vpop.f32.mrb[3].mxu1  ;;  %v3570_v41 = vpop.f32.mrb[5].mxu0 }
 0x1e0   :  { %v521_v42 = vpop.f32.mrb[4].mxu1  ;;  %v597_v43 = vpop.f32.mrb[6].mxu0 }
 0x1e1   :  { %v4162_v44 = vadd.f32 %v521_v42, %v291_v35  ;;  %v4164_v45 = vadd.f32 %v597_v43, %v291_v35  ;;  %v3575_v46 = vpop.f32.mrb[5].mxu1  ;;  %v3580_v47 = vpop.f32.mrb[7].mxu0 }
 0x1e4   :  { %v673_v48 = vpop.f32.mrb[6].mxu1  ;;  %v749_v49 = vpop.f32.mrb[8].mxu0 }
 0x1e5   :  { %v4166_v50 = vadd.f32 %v673_v48, %v291_v35  ;;  %v4168_v51 = vadd.f32 %v749_v49, %v291_v35  ;;  %v3585_v52 = vpop.f32.mrb[7].mxu1  ;;  %v3590_v53 = vpop.f32.mrb[9].mxu0 }
 0x1e8   :  { %v825_v54 = vpop.f32.mrb[8].mxu1  ;;  %v901_v55 = vpop.f32.mrb[10].mxu0 }
 0x1e9   :  { %v4170_v56 = vadd.f32 %v825_v54, %v291_v35  ;;  %v4172_v57 = vadd.f32 %v901_v55, %v291_v35  ;;  %v3595_v58 = vpop.f32.mrb[9].mxu1  ;;  %v3600_v59 = vpop.f32.mrb[11].mxu0 }
 0x1ec   :  { %v979_v61 = vpop.f32.mrb[10].mxu1 }
 0x1ed   :  { %v980_v62 = vadd.f32 %v4174_v60, %v979_v61  ;;  %v3607_v63 = vpop.f32.mrb[11].mxu1 }
 0x1ee   :  { %v1053_v25 = vpop.f32.mrb[12].mxu0 }
 0x1ef   :  { %1065 = vrot.lane.b32.xlu0 %v980_v62, %s4022_s2  ;;  %v1057_v1 = vadd.f32 %v980_v62, %v373_v38  ;;  %v1054_v26 = vadd.f32 %v4194_v24, %v1053_v25  ;;  %v3614_v27 = vpop.f32.mrb[13].mxu0 }
 0x1f1   :  { %v3392_v2 = vmul.f32 -1.442695, %v1057_v1 }
 0x1f3   :  { %3891 = vpow2.f32 %v3392_v2 }
 0x1fd   :  { %v3892_v3 = vpop.eup %3891 }
 0x1fe   :  { %v1061_v4 = vadd.f32 1.0, %v3892_v3 }
 0x200   :  { %3893 = vrcp.f32 %v1061_v4 }
 0x20a   :  { %v3894_v5 = vpop.eup %3893 }
 0x20b   :  { %v1075_v19 = vsub.f32 1.0, %v3894_v5  ;;  %v1081_v21 = vmul.f32 0.0, %v3894_v5 }
 0x261   :  { %v1066_v7 = vpop.permute.xlu0 %1065 }
 0x262   :  { %v1068_v8 = vmul.f32 %v3894_v5, %v1066_v7 }
 0x264   :  { %1070 = vrot.lane.b32.xlu0 %v1068_v8, %s4023_s17 }
 0x268   :  { %1170 = vrot.lane.b32.xlu0 %v1054_v26, %s4022_s2 }
 0x2d6   :  { %v1071_v9 = vpop.permute.xlu0 %1070 }
 0x2d7   :  { %v1073_v10 = vadd.f32 %v1071_v9, %v373_v38 }
 0x2d9   :  { %3895 = vtanh.f32 %v1073_v10 }
 0x2da   :  { %v1171_v43 = vpop.permute.xlu0 %1170 }
 0x2e3   :  { %v3896_v17 = vpop.eup %3895 }
 0x2e4   :  { %1077 = vrot.lane.b32.xlu1 %v3896_v17, %s4024_s18 }
 0x356   :  { %v1078_v20 = vpop.permute.xlu1 %1077 }
 0x357   :  { %v1080_v22 = vmul.f32 %v1078_v20, %v1075_v19 }
 0x359   :  { %v1082_v23 = vadd.f32 %v1081_v21, %v1080_v22 }
 0x35b   :  { %1088 = vrot.lane.b32.xlu1 %v1082_v23, %s4024_s18 }
 0x3cd   :  { %v1089_v28 = vpop.permute.xlu1 %1088 }
 0x3ce   :  { %3620 = vmatmul.mubr.msk.f32.vlgmr.msra.gmra.mrb[12].mxu1 %vm122_vm2, %v1089_v28  ;;  %3627 = vmatmul.mubr.msk.f32.vlgmr.msra.gmra.mrb[14].mxu0 %vm122_vm2, %v1089_v28 }
 0x3cf   :  { %3810 = vmatpush3.bf16.msra.mxu1 %v4179_v14  ;;  %3633 = vmatprep.mubr.msk.f32.mxu1 %vm4020_vm0, %v4019_v0 }
 0x3d0   :  { %3814 = vmatprep.subr.bf16.mxu1 %v4021_v6  ;;  %3813 = vmatpush3.bf16.msra.mxu0 %v4181_v16 }
 0x3d1   :  { %3640 = vmatprep.mubr.msk.f32.mxu0 %vm4020_vm0, %v4019_v0  ;;  %3817 = vmatprep.subr.bf16.mxu0 %v4021_v6 }
 0x4a1   :  { %v1158_v32 = vpop.f32.mrb[12].mxu1  ;;  %v1254_v33 = vpop.f32.mrb[14].mxu0 }
 0x4a2   :  { %v1159_v34 = vadd.f32 %v4208_v31, %v1158_v32  ;;  %v1255_v35 = vadd.f32 %v4174_v60, %v1254_v33  ;;  %v3621_v36 = vpop.f32.mrb[13].mxu1  ;;  %v3628_v37 = vpop.f32.mrb[15].mxu0 }
 0x4a4   :  { %v1162_v38 = vadd.f32 %v1159_v34, %v1054_v26  ;;  %1341 = vrot.lane.b32.xlu1 %v1255_v35, %s4022_s2  ;;  %v1333_v48 = vadd.f32 %v1255_v35, %v4160_v39 }
 0x4a6   :  { %v3395_v40 = vmul.f32 -1.442695, %v1162_v38  ;;  %v3398_v49 = vmul.f32 -1.442695, %v1333_v48 }
 0x4a8   :  { %3897 = vpow2.f32 %v3395_v40 }
 0x4b2   :  { %v3898_v41 = vpop.eup %3897 }
 0x4b3   :  { %v1166_v42 = vadd.f32 1.0, %v3898_v41 }
 0x4b5   :  { %3899 = vrcp.f32 %v1166_v42 }
 0x4b6   :  { %3901 = vpow2.f32 %v3398_v49 }
 0x4bf   :  { %v3900_v46 = vpop.eup %3899 }
 0x4c0   :  { %v1173_v47 = vmul.f32 %v3900_v46, %v1171_v43  ;;  %v3902_v52 = vpop.eup %3901  ;;  %v1180_v3 = vsub.f32 1.0, %v3900_v46  ;;  %v1186_v5 = vmul.f32 0.0, %v3900_v46 }
 0x4c1   :  { %v1337_v53 = vadd.f32 1.0, %v3902_v52 }
 0x4c2   :  { %1175 = vrot.lane.b32.xlu0 %v1173_v47, %s4023_s17 }
 0x4c3   :  { %3903 = vrcp.f32 %v1337_v53 }
 0x4cd   :  { %v3904_v54 = vpop.eup %3903 }
 0x4ce   :  { %v1351_v9 = vsub.f32 1.0, %v3904_v54  ;;  %v1357_v11 = vmul.f32 %v3904_v54, %v1082_v23 }
 0x516   :  { %v1342_v55 = vpop.permute.xlu1 %1341 }
 0x517   :  { %v1344_v58 = vmul.f32 %v3904_v54, %v1342_v55 }
 0x519   :  { %1346 = vrot.lane.b32.xlu1 %v1344_v58, %s4023_s17 }
 0x534   :  { %v1176_v59 = vpop.permute.xlu0 %1175 }
 0x535   :  { %v1178_v61 = vadd.f32 %v1176_v59, %v1159_v34 }
 0x537   :  { %3905 = vtanh.f32 %v1178_v61 }
 0x541   :  { %v3906_v62 = vpop.eup %3905 }
 0x542   :  { %1182 = vrot.lane.b32.xlu0 %v3906_v62, %s4024_s18 }
 0x58b   :  { %v1347_v63 = vpop.permute.xlu1 %1346 }
 0x58c   :  { %v1349_v1 = vadd.f32 %v1347_v63, %v4160_v39 }
 0x58e   :  { %3907 = vtanh.f32 %v1349_v1 }
 0x598   :  { %v3908_v2 = vpop.eup %3907 }
 0x599   :  { %1353 = vrot.lane.b32.xlu1 %v3908_v2, %s4024_s18 }
 0x5b4   :  { %v1183_v4 = vpop.permute.xlu0 %1182 }
 0x5b5   :  { %v1185_v7 = vmul.f32 %v1183_v4, %v1180_v3 }
 0x5b7   :  { %v4219_v8 = vadd.f32 %v1186_v5, %v1185_v7 }
 0x5b9   :  { %1259 = vrot.lane.b32.xlu0 %v4219_v8, %s4024_s18 }
 0x60b   :  { %v1354_v10 = vpop.permute.xlu1 %1353 }
 0x60c   :  { %v1356_v12 = vmul.f32 %v1354_v10, %v1351_v9 }
 0x60e   :  { %v4223_v13 = vadd.f32 %v1357_v11, %v1356_v12 }
 0x610   :  { %1360 = vrot.lane.b32.xlu1 %v4223_v13, %s4024_s18 }
 0x62b   :  { %v1260_v39 = vpop.permute.xlu0 %1259 }
 0x62c   :  { %3634 = vmatmul.mubr.msk.f32.vlgmr.msra.gmra.mrb[14].mxu1 %vm122_vm2, %v1260_v39 }
 0x62d   :  { %3816 = vmatpush3.bf16.msra.mxu1 %v4140_v29  ;;  %3647 = vmatprep.mubr.msk.f32.mxu1 %vm4020_vm0, %v4019_v0 }
 0x62e   :  { %3820 = vmatprep.subr.bf16.mxu1 %v4021_v6 }
 0x682   :  { %v1361_v15 = vpop.permute.xlu1 %1360 }
 0x683   :  { %3641 = vmatmul.mubr.msk.f32.vlgmr.msra.gmra.mrb[16].mxu0 %vm122_vm2, %v1361_v15  ;;  %3648 = vmatmul.mubr.msk.f32.vlgmr.msra.gmra.mrb[16].mxu1 %vm122_vm2, %v1361_v15 }
 0x684   :  { %3819 = vmatpush3.bf16.msra.mxu0 %v4179_v14  ;;  %3654 = vmatprep.mubr.msk.f32.mxu0 %vm4020_vm0, %v4019_v0 }
 0x685   :  { %3823 = vmatprep.subr.bf16.mxu0 %v4021_v6  ;;  %3822 = vmatpush3.bf16.msra.mxu1 %v4181_v16 }
 0x686   :  { %3661 = vmatprep.mubr.msk.f32.mxu1 %vm4020_vm0, %v4019_v0  ;;  %3826 = vmatprep.subr.bf16.mxu1 %v4021_v6 }
 0x6ff   :  { %v1329_v17 = vpop.f32.mrb[14].mxu1 }
 0x700   :  { %v1330_v19 = vadd.f32 %v4194_v24, %v1329_v17  ;;  %v3635_v20 = vpop.f32.mrb[15].mxu1 }
 0x702   :  { %1442 = vrot.lane.b32.xlu0 %v1330_v19, %s4022_s2 }
 0x756   :  { %v1430_v21 = vpop.f32.mrb[16].mxu0  ;;  %v1526_v22 = vpop.f32.mrb[16].mxu1 }
 0x757   :  { %v1431_v23 = vadd.f32 %v4208_v31, %v1430_v21  ;;  %v1527_v25 = vadd.f32 %v4174_v60, %v1526_v22  ;;  %v3642_v26 = vpop.f32.mrb[17].mxu0  ;;  %v3649_v27 = vpop.f32.mrb[17].mxu1 }
 0x759   :  { %v1434_v28 = vadd.f32 %v1431_v23, %v1330_v19  ;;  %1613 = vrot.lane.b32.xlu1 %v1527_v25, %s4022_s2  ;;  %v1605_v38 = vadd.f32 %v1527_v25, %v4162_v44 }
 0x75b   :  { %v3400_v32 = vmul.f32 -1.442695, %v1434_v28  ;;  %v3403_v40 = vmul.f32 -1.442695, %v1605_v38 }
 0x75d   :  { %3909 = vpow2.f32 %v3400_v32 }
 0x767   :  { %v3910_v33 = vpop.eup %3909 }
 0x768   :  { %v1438_v34 = vadd.f32 1.0, %v3910_v33 }
 0x76a   :  { %3911 = vrcp.f32 %v1438_v34 }
 0x76b   :  { %3913 = vpow2.f32 %v3403_v40 }
 0x774   :  { %v3912_v35 = vpop.eup %3911  ;;  %v1443_v36 = vpop.permute.xlu0 %1442 }
 0x775   :  { %v1445_v37 = vmul.f32 %v3912_v35, %v1443_v36  ;;  %v3914_v41 = vpop.eup %3913  ;;  %v1452_v58 = vsub.f32 1.0, %v3912_v35  ;;  %v1458_v61 = vmul.f32 %v3912_v35, %v4219_v8 }
 0x776   :  { %v1609_v42 = vadd.f32 1.0, %v3914_v41 }
 0x777   :  { %1447 = vrot.lane.b32.xlu0 %v1445_v37, %s4023_s17 }
 0x778   :  { %3915 = vrcp.f32 %v1609_v42 }
 0x782   :  { %v3916_v43 = vpop.eup %3915 }
 0x783   :  { %v1623_v1 = vsub.f32 1.0, %v3916_v43  ;;  %v1629_v3 = vmul.f32 %v3916_v43, %v4223_v13 }
 0x7cb   :  { %v1614_v46 = vpop.permute.xlu1 %1613 }
 0x7cc   :  { %v1616_v47 = vmul.f32 %v3916_v43, %v1614_v46 }
 0x7ce   :  { %1618 = vrot.lane.b32.xlu1 %v1616_v47, %s4023_s17 }
 0x7e9   :  { %v1448_v48 = vpop.permute.xlu0 %1447 }
 0x7ea   :  { %v1450_v49 = vadd.f32 %v1448_v48, %v1431_v23 }
 0x7ec   :  { %3917 = vtanh.f32 %v1450_v49 }
 0x7f6   :  { %v3918_v52 = vpop.eup %3917 }
 0x7f7   :  { %1454 = vrot.lane.b32.xlu0 %v3918_v52, %s4024_s18 }
 0x840   :  { %v1619_v53 = vpop.permute.xlu1 %1618 }
 0x841   :  { %v1621_v54 = vadd.f32 %v1619_v53, %v4162_v44 }
 0x843   :  { %3919 = vtanh.f32 %v1621_v54 }
 0x84d   :  { %v3920_v55 = vpop.eup %3919 }
 0x84e   :  { %1625 = vrot.lane.b32.xlu1 %v3920_v55, %s4024_s18 }
 0x869   :  { %v1455_v59 = vpop.permute.xlu0 %1454 }
 0x86a   :  { %v1457_v62 = vmul.f32 %v1455_v59, %v1452_v58 }
 0x86c   :  { %v4254_v63 = vadd.f32 %v1458_v61, %v1457_v62 }
 0x86e   :  { %1531 = vrot.lane.b32.xlu0 %v4254_v63, %s4024_s18 }
 0x8c0   :  { %v1626_v2 = vpop.permute.xlu1 %1625 }
 0x8c1   :  { %v1628_v4 = vmul.f32 %v1626_v2, %v1623_v1 }
 0x8c3   :  { %v4259_v44 = vadd.f32 %v1629_v3, %v1628_v4 }
 0x8c5   :  { %1632 = vrot.lane.b32.xlu1 %v4259_v44, %s4024_s18 }
 0x8e0   :  { %v1532_v5 = vpop.permute.xlu0 %1531 }
 0x8e1   :  { %3655 = vmatmul.mubr.msk.f32.vlgmr.msra.gmra.mrb[18].mxu0 %vm122_vm2, %v1532_v5 }
 0x8e2   :  { %3825 = vmatpush3.bf16.msra.mxu0 %v4140_v29  ;;  %3668 = vmatprep.mubr.msk.f32.mxu0 %vm4020_vm0, %v4019_v0 }
 0x8e3   :  { %3829 = vmatprep.subr.bf16.mxu0 %v4021_v6 }
 0x937   :  { %v1633_v7 = vpop.permute.xlu1 %1632 }
 0x938   :  { %3662 = vmatmul.mubr.msk.f32.vlgmr.msra.gmra.mrb[18].mxu1 %vm122_vm2, %v1633_v7  ;;  %3669 = vmatmul.mubr.msk.f32.vlgmr.msra.gmra.mrb[20].mxu0 %vm122_vm2, %v1633_v7 }
 0x939   :  { %3828 = vmatpush3.bf16.msra.mxu1 %v4179_v14  ;;  %3675 = vmatprep.mubr.msk.f32.mxu1 %vm4020_vm0, %v4019_v0 }
 0x93a   :  { %3832 = vmatprep.subr.bf16.mxu1 %v4021_v6  ;;  %3831 = vmatpush3.bf16.msra.mxu0 %v4181_v16 }
 0x93b   :  { %3682 = vmatprep.mubr.msk.f32.mxu0 %vm4020_vm0, %v4019_v0  ;;  %3835 = vmatprep.subr.bf16.mxu0 %v4021_v6 }
 0x9b4   :  { %v1601_v8 = vpop.f32.mrb[18].mxu0 }
 0x9b5   :  { %v1602_v9 = vadd.f32 %v4194_v24, %v1601_v8  ;;  %v3656_v10 = vpop.f32.mrb[19].mxu0 }
 0x9b7   :  { %1714 = vrot.lane.b32.xlu0 %v1602_v9, %s4022_s2 }
 0xa0b   :  { %v1702_v11 = vpop.f32.mrb[18].mxu1  ;;  %v1798_v12 = vpop.f32.mrb[20].mxu0 }
 0xa0c   :  { %v1703_v13 = vadd.f32 %v4208_v31, %v1702_v11  ;;  %v1799_v39 = vadd.f32 %v4174_v60, %v1798_v12  ;;  %v3663_v15 = vpop.f32.mrb[19].mxu1  ;;  %v3670_v17 = vpop.f32.mrb[21].mxu0 }
 0xa0e   :  { %v1706_v19 = vadd.f32 %v1703_v13, %v1602_v9  ;;  %1885 = vrot.lane.b32.xlu1 %v1799_v39, %s4022_s2  ;;  %v1877_v27 = vadd.f32 %v1799_v39, %v4164_v45 }
 0xa10   :  { %v3405_v20 = vmul.f32 -1.442695, %v1706_v19  ;;  %v3408_v28 = vmul.f32 -1.442695, %v1877_v27 }
 0xa12   :  { %3921 = vpow2.f32 %v3405_v20 }
 0xa1c   :  { %v3922_v21 = vpop.eup %3921 }
 0xa1d   :  { %v1710_v22 = vadd.f32 1.0, %v3922_v21 }
 0xa1f   :  { %3923 = vrcp.f32 %v1710_v22 }
 0xa20   :  { %3925 = vpow2.f32 %v3408_v28 }
 0xa29   :  { %v3924_v23 = vpop.eup %3923  ;;  %v1715_v25 = vpop.permute.xlu0 %1714 }
 0xa2a   :  { %v1717_v26 = vmul.f32 %v3924_v23, %v1715_v25  ;;  %v3926_v32 = vpop.eup %3925  ;;  %v1724_v46 = vsub.f32 1.0, %v3924_v23  ;;  %v1730_v48 = vmul.f32 %v3924_v23, %v4254_v63 }
 0xa2b   :  { %v1881_v33 = vadd.f32 1.0, %v3926_v32 }
 0xa2c   :  { %1719 = vrot.lane.b32.xlu0 %v1717_v26, %s4023_s17 }
 0xa2d   :  { %3927 = vrcp.f32 %v1881_v33 }
 0xa37   :  { %v3928_v34 = vpop.eup %3927 }
 0xa38   :  { %v1895_v53 = vsub.f32 1.0, %v3928_v34  ;;  %v1901_v55 = vmul.f32 %v3928_v34, %v4259_v44 }
 0xa80   :  { %v1886_v35 = vpop.permute.xlu1 %1885 }
 0xa81   :  { %v1888_v36 = vmul.f32 %v3928_v34, %v1886_v35 }
 0xa83   :  { %1890 = vrot.lane.b32.xlu1 %v1888_v36, %s4023_s17 }
 0xa9e   :  { %v1720_v37 = vpop.permute.xlu0 %1719 }
 0xa9f   :  { %v1722_v38 = vadd.f32 %v1720_v37, %v1703_v13 }
 0xaa1   :  { %3929 = vtanh.f32 %v1722_v38 }
 0xaab   :  { %v3930_v40 = vpop.eup %3929 }
 0xaac   :  { %1726 = vrot.lane.b32.xlu0 %v3930_v40, %s4024_s18 }
 0xaf5   :  { %v1891_v41 = vpop.permute.xlu1 %1890 }
 0xaf6   :  { %v1893_v42 = vadd.f32 %v1891_v41, %v4164_v45 }
 0xaf8   :  { %3931 = vtanh.f32 %v1893_v42 }
 0xb02   :  { %v3932_v43 = vpop.eup %3931 }
 0xb03   :  { %1897 = vrot.lane.b32.xlu1 %v3932_v43, %s4024_s18 }
 0xb1e   :  { %v1727_v47 = vpop.permute.xlu0 %1726 }
 0xb1f   :  { %v1729_v49 = vmul.f32 %v1727_v47, %v1724_v46 }
 0xb21   :  { %v4290_v52 = vadd.f32 %v1730_v48, %v1729_v49 }
 0xb23   :  { %1803 = vrot.lane.b32.xlu0 %v4290_v52, %s4024_s18 }
 0xb75   :  { %v1898_v54 = vpop.permute.xlu1 %1897 }
 0xb76   :  { %v1900_v58 = vmul.f32 %v1898_v54, %v1895_v53 }
 0xb78   :  { %v4295_v45 = vadd.f32 %v1901_v55, %v1900_v58 }
 0xb7a   :  { %1904 = vrot.lane.b32.xlu1 %v4295_v45, %s4024_s18 }
 0xb95   :  { %v1804_v59 = vpop.permute.xlu0 %1803 }
 0xb96   :  { %3676 = vmatmul.mubr.msk.f32.vlgmr.msra.gmra.mrb[20].mxu1 %vm122_vm2, %v1804_v59 }
 0xb97   :  { %3834 = vmatpush3.bf16.msra.mxu1 %v4140_v29  ;;  %3689 = vmatprep.mubr.msk.f32.mxu1 %vm4020_vm0, %v4019_v0 }
 0xb98   :  { %3838 = vmatprep.subr.bf16.mxu1 %v4021_v6 }
 0xbec   :  { %v1905_v61 = vpop.permute.xlu1 %1904 }
 0xbed   :  { %3683 = vmatmul.mubr.msk.f32.vlgmr.msra.gmra.mrb[22].mxu0 %vm122_vm2, %v1905_v61  ;;  %3690 = vmatmul.mubr.msk.f32.vlgmr.msra.gmra.mrb[22].mxu1 %vm122_vm2, %v1905_v61 }
 0xbee   :  { %3837 = vmatpush3.bf16.msra.mxu0 %v4179_v14  ;;  %3696 = vmatprep.mubr.msk.f32.mxu0 %vm4020_vm0, %v4019_v0 }
 0xbef   :  { %3841 = vmatprep.subr.bf16.mxu0 %v4021_v6  ;;  %3840 = vmatpush3.bf16.msra.mxu1 %v4181_v16 }
 0xbf0   :  { %3703 = vmatprep.mubr.msk.f32.mxu1 %vm4020_vm0, %v4019_v0  ;;  %3844 = vmatprep.subr.bf16.mxu1 %v4021_v6 }
 0xc69   :  { %v1873_v62 = vpop.f32.mrb[20].mxu1 }
 0xc6a   :  { %v1874_v63 = vadd.f32 %v4194_v24, %v1873_v62  ;;  %v3677_v1 = vpop.f32.mrb[21].mxu1 }
 0xc6c   :  { %1986 = vrot.lane.b32.xlu0 %v1874_v63, %s4022_s2 }
 0xcc0   :  { %v1974_v2 = vpop.f32.mrb[22].mxu0  ;;  %v2070_v3 = vpop.f32.mrb[22].mxu1 }
 0xcc1   :  { %v1975_v4 = vadd.f32 %v4208_v31, %v1974_v2  ;;  %v2071_v44 = vadd.f32 %v4174_v60, %v2070_v3  ;;  %v3684_v5 = vpop.f32.mrb[23].mxu0  ;;  %v3691_v7 = vpop.f32.mrb[23].mxu1 }
 0xcc3   :  { %v1978_v8 = vadd.f32 %v1975_v4, %v1874_v63  ;;  %2157 = vrot.lane.b32.xlu1 %v2071_v44, %s4022_s2  ;;  %v2149_v15 = vadd.f32 %v2071_v44, %v4166_v50 }
 0xcc5   :  { %v3410_v9 = vmul.f32 -1.442695, %v1978_v8  ;;  %v3413_v17 = vmul.f32 -1.442695, %v2149_v15 }
 0xcc7   :  { %3933 = vpow2.f32 %v3410_v9 }
 0xcd1   :  { %v3934_v10 = vpop.eup %3933 }
 0xcd2   :  { %v1982_v11 = vadd.f32 1.0, %v3934_v10 }
 0xcd4   :  { %3935 = vrcp.f32 %v1982_v11 }
 0xcd5   :  { %3937 = vpow2.f32 %v3413_v17 }
 0xcde   :  { %v3936_v12 = vpop.eup %3935  ;;  %v1987_v13 = vpop.permute.xlu0 %1986 }
 0xcdf   :  { %v1989_v39 = vmul.f32 %v3936_v12, %v1987_v13  ;;  %v3938_v19 = vpop.eup %3937  ;;  %v1996_v34 = vsub.f32 1.0, %v3936_v12  ;;  %v2002_v36 = vmul.f32 %v3936_v12, %v4290_v52 }
 0xce0   :  { %v2153_v20 = vadd.f32 1.0, %v3938_v19 }
 0xce1   :  { %1991 = vrot.lane.b32.xlu0 %v1989_v39, %s4023_s17 }
 0xce2   :  { %3939 = vrcp.f32 %v2153_v20 }
 0xcec   :  { %v3940_v21 = vpop.eup %3939 }
 0xced   :  { %v2167_v40 = vsub.f32 1.0, %v3940_v21  ;;  %v2173_v42 = vmul.f32 %v3940_v21, %v4295_v45 }
 0xd35   :  { %v2158_v22 = vpop.permute.xlu1 %2157 }
 0xd36   :  { %v2160_v23 = vmul.f32 %v3940_v21, %v2158_v22 }
 0xd38   :  { %2162 = vrot.lane.b32.xlu1 %v2160_v23, %s4023_s17 }
 0xd53   :  { %v1992_v25 = vpop.permute.xlu0 %1991 }
 0xd54   :  { %v1994_v26 = vadd.f32 %v1992_v25, %v1975_v4 }
 0xd56   :  { %3941 = vtanh.f32 %v1994_v26 }
 0xd60   :  { %v3942_v27 = vpop.eup %3941 }
 0xd61   :  { %1998 = vrot.lane.b32.xlu0 %v3942_v27, %s4024_s18 }
 0xdaa   :  { %v2163_v28 = vpop.permute.xlu1 %2162 }
 0xdab   :  { %v2165_v32 = vadd.f32 %v2163_v28, %v4166_v50 }
 0xdad   :  { %3943 = vtanh.f32 %v2165_v32 }
 0xdb7   :  { %v3944_v33 = vpop.eup %3943 }
 0xdb8   :  { %2169 = vrot.lane.b32.xlu1 %v3944_v33, %s4024_s18 }
 0xdd3   :  { %v1999_v35 = vpop.permute.xlu0 %1998 }
 0xdd4   :  { %v2001_v37 = vmul.f32 %v1999_v35, %v1996_v34 }
 0xdd6   :  { %v4326_v38 = vadd.f32 %v2002_v36, %v2001_v37 }
 0xdd8   :  { %2075 = vrot.lane.b32.xlu0 %v4326_v38, %s4024_s18 }
 0xe2a   :  { %v2170_v41 = vpop.permute.xlu1 %2169 }
 0xe2b   :  { %v2172_v43 = vmul.f32 %v2170_v41, %v2167_v40 }
 0xe2d   :  { %v4331_v50 = vadd.f32 %v2173_v42, %v2172_v43 }
 0xe2f   :  { %2176 = vrot.lane.b32.xlu1 %v4331_v50, %s4024_s18 }
 0xe4a   :  { %v2076_v46 = vpop.permute.xlu0 %2075 }
 0xe4b   :  { %3697 = vmatmul.mubr.msk.f32.vlgmr.msra.gmra.mrb[24].mxu0 %vm122_vm2, %v2076_v46 }
 0xe4c   :  { %3843 = vmatpush3.bf16.msra.mxu0 %v4140_v29  ;;  %3710 = vmatprep.mubr.msk.f32.mxu0 %vm4020_vm0, %v4019_v0 }
 0xe4d   :  { %3847 = vmatprep.subr.bf16.mxu0 %v4021_v6 }
 0xea1   :  { %v2177_v47 = vpop.permute.xlu1 %2176 }
 0xea2   :  { %3704 = vmatmul.mubr.msk.f32.vlgmr.msra.gmra.mrb[24].mxu1 %vm122_vm2, %v2177_v47  ;;  %3711 = vmatmul.mubr.msk.f32.vlgmr.msra.gmra.mrb[26].mxu0 %vm122_vm2, %v2177_v47 }
 0xea3   :  { %3846 = vmatpush3.bf16.msra.mxu1 %v4179_v14  ;;  %3717 = vmatprep.mubr.msk.f32.mxu1 %vm4020_vm0, %v4019_v0 }
 0xea4   :  { %3850 = vmatprep.subr.bf16.mxu1 %v4021_v6  ;;  %3849 = vmatpush3.bf16.msra.mxu0 %v4181_v16 }
 0xea5   :  { %3724 = vmatprep.mubr.msk.f32.mxu0 %vm4020_vm0, %v4019_v0  ;;  %3853 = vmatprep.subr.bf16.mxu0 %v4021_v6 }
 0xf1e   :  { %v2145_v48 = vpop.f32.mrb[24].mxu0 }
 0xf1f   :  { %v2146_v49 = vadd.f32 %v4194_v24, %v2145_v48  ;;  %v3698_v52 = vpop.f32.mrb[25].mxu0 }
 0xf21   :  { %2258 = vrot.lane.b32.xlu0 %v2146_v49, %s4022_s2 }
 0xf75   :  { %v2246_v53 = vpop.f32.mrb[24].mxu1  ;;  %v2342_v54 = vpop.f32.mrb[26].mxu0 }
 0xf76   :  { %v2247_v55 = vadd.f32 %v4208_v31, %v2246_v53  ;;  %v2343_v58 = vadd.f32 %v4174_v60, %v2342_v54  ;;  %v3705_v45 = vpop.f32.mrb[25].mxu1  ;;  %v3712_v59 = vpop.f32.mrb[27].mxu0 }
 0xf78   :  { %v2250_v61 = vadd.f32 %v2247_v55, %v2146_v49  ;;  %2429 = vrot.lane.b32.xlu1 %v2343_v58, %s4022_s2  ;;  %v2421_v44 = vadd.f32 %v2343_v58, %v4168_v51 }
 0xf7a   :  { %v3415_v62 = vmul.f32 -1.442695, %v2250_v61  ;;  %v3418_v5 = vmul.f32 -1.442695, %v2421_v44 }
 0xf7c   :  { %3945 = vpow2.f32 %v3415_v62 }
 0xf86   :  { %v3946_v63 = vpop.eup %3945 }
 0xf87   :  { %v2254_v1 = vadd.f32 1.0, %v3946_v63 }
 0xf89   :  { %3947 = vrcp.f32 %v2254_v1 }
 0xf8a   :  { %3949 = vpow2.f32 %v3418_v5 }
 0xf93   :  { %v3948_v2 = vpop.eup %3947  ;;  %v2259_v3 = vpop.permute.xlu0 %2258 }
 0xf94   :  { %v2261_v4 = vmul.f32 %v3948_v2, %v2259_v3  ;;  %v3950_v7 = vpop.eup %3949  ;;  %v2268_v20 = vsub.f32 1.0, %v3948_v2  ;;  %v2274_v22 = vmul.f32 %v3948_v2, %v4326_v38 }
 0xf95   :  { %v2425_v8 = vadd.f32 1.0, %v3950_v7 }
 0xf96   :  { %2263 = vrot.lane.b32.xlu0 %v2261_v4, %s4023_s17 }
 0xf97   :  { %3951 = vrcp.f32 %v2425_v8 }
 0xfa1   :  { %v3952_v9 = vpop.eup %3951 }
 0xfa2   :  { %v2439_v26 = vsub.f32 1.0, %v3952_v9  ;;  %v2445_v28 = vmul.f32 %v3952_v9, %v4331_v50 }
 0xfea   :  { %v2430_v10 = vpop.permute.xlu1 %2429 }
 0xfeb   :  { %v2432_v11 = vmul.f32 %v3952_v9, %v2430_v10 }
 0xfed   :  { %2434 = vrot.lane.b32.xlu1 %v2432_v11, %s4023_s17 }
0x1008   :  { %v2264_v12 = vpop.permute.xlu0 %2263 }
0x1009   :  { %v2266_v13 = vadd.f32 %v2264_v12, %v2247_v55 }
0x100b   :  { %3953 = vtanh.f32 %v2266_v13 }
0x1015   :  { %v3954_v39 = vpop.eup %3953 }
0x1016   :  { %2270 = vrot.lane.b32.xlu0 %v3954_v39, %s4024_s18 }
0x105f   :  { %v2435_v15 = vpop.permute.xlu1 %2434 }
0x1060   :  { %v2437_v17 = vadd.f32 %v2435_v15, %v4168_v51 }
0x1062   :  { %3955 = vtanh.f32 %v2437_v17  ;;  %v4412_v17 = vld [vmem:[%s4481_s3] sm:$0xff] }
0x106c   :  { %v3956_v19 = vpop.eup %3955 }
0x106d   :  { %2441 = vrot.lane.b32.xlu1 %v3956_v19, %s4024_s18 }
0x1088   :  { %v2271_v21 = vpop.permute.xlu0 %2270 }
0x1089   :  { %v2273_v23 = vmul.f32 %v2271_v21, %v2268_v20 }
0x108b   :  { %v4362_v25 = vadd.f32 %v2274_v22, %v2273_v23 }
0x108d   :  { %2347 = vrot.lane.b32.xlu0 %v4362_v25, %s4024_s18 }
0x10df   :  { %v2442_v27 = vpop.permute.xlu1 %2441 }
0x10e0   :  { %v2444_v32 = vmul.f32 %v2442_v27, %v2439_v26 }
0x10e2   :  { %v4367_v51 = vadd.f32 %v2445_v28, %v2444_v32 }
0x10e4   :  { %2448 = vrot.lane.b32.xlu1 %v4367_v51, %s4024_s18 }
0x10ff   :  { %v2348_v33 = vpop.permute.xlu0 %2347 }
0x1100   :  { %3718 = vmatmul.mubr.msk.f32.vlgmr.msra.gmra.mrb[26].mxu1 %vm122_vm2, %v2348_v33 }
0x1101   :  { %3852 = vmatpush3.bf16.msra.mxu1 %v4140_v29  ;;  %3731 = vmatprep.mubr.msk.f32.mxu1 %vm4020_vm0, %v4019_v0 }
0x1102   :  { %3856 = vmatprep.subr.bf16.mxu1 %v4021_v6 }
0x1156   :  { %v2449_v34 = vpop.permute.xlu1 %2448 }
0x1157   :  { %3725 = vmatmul.mubr.msk.f32.vlgmr.msra.gmra.mrb[28].mxu0 %vm122_vm2, %v2449_v34  ;;  %3732 = vmatmul.mubr.msk.f32.vlgmr.msra.gmra.mrb[28].mxu1 %vm122_vm2, %v2449_v34 }
0x1158   :  { %3855 = vmatpush3.bf16.msra.mxu0 %v4179_v14  ;;  %3738 = vmatprep.mubr.msk.f32.mxu0 %vm4020_vm0, %v4019_v0 }
0x1159   :  { %3859 = vmatprep.subr.bf16.mxu0 %v4021_v6  ;;  %3858 = vmatpush3.bf16.msra.mxu1 %v4181_v16 }
0x115a   :  { %3745 = vmatprep.mubr.msk.f32.mxu1 %vm4020_vm0, %v4019_v0  ;;  %3862 = vmatprep.subr.bf16.mxu1 %v4021_v6 }
0x11d3   :  { %v2417_v35 = vpop.f32.mrb[26].mxu1 }
0x11d4   :  { %v2418_v36 = vadd.f32 %v4194_v24, %v2417_v35  ;;  %v3719_v37 = vpop.f32.mrb[27].mxu1 }
0x11d6   :  { %2530 = vrot.lane.b32.xlu0 %v2418_v36, %s4022_s2 }
0x122a   :  { %v2518_v38 = vpop.f32.mrb[28].mxu0  ;;  %v2614_v40 = vpop.f32.mrb[28].mxu1 }
0x122b   :  { %v2519_v41 = vadd.f32 %v4208_v31, %v2518_v38  ;;  %v2615_v42 = vadd.f32 %v4174_v60, %v2614_v40  ;;  %v3726_v43 = vpop.f32.mrb[29].mxu0  ;;  %v3733_v50 = vpop.f32.mrb[29].mxu1 }
0x122d   :  { %v2522_v46 = vadd.f32 %v2519_v41, %v2418_v36  ;;  %2701 = vrot.lane.b32.xlu1 %v2615_v42, %s4022_s2  ;;  %v2693_v54 = vadd.f32 %v2615_v42, %v4170_v56 }
0x122f   :  { %v3420_v0 = vmul.f32 -1.442695, %v2522_v46  ;;  %v3423_v55 = vmul.f32 -1.442695, %v2693_v54 }
0x1231   :  { %3957 = vpow2.f32 %v3420_v0 }
0x123b   :  { %v3958_v47 = vpop.eup %3957 }
0x123c   :  { %v2526_v48 = vadd.f32 1.0, %v3958_v47 }
0x123e   :  { %3959 = vrcp.f32 %v2526_v48 }
0x123f   :  { %3961 = vpow2.f32 %v3423_v55 }
0x1248   :  { %v3960_v49 = vpop.eup %3959  ;;  %v2531_v52 = vpop.permute.xlu0 %2530 }
0x1249   :  { %v2533_v53 = vmul.f32 %v3960_v49, %v2531_v52  ;;  %v3962_v58 = vpop.eup %3961  ;;  %v2540_v5 = vsub.f32 1.0, %v3960_v49  ;;  %v2546_v8 = vmul.f32 %v3960_v49, %v4362_v25 }
0x124a   :  { %v2697_v45 = vadd.f32 1.0, %v3962_v58 }
0x124b   :  { %2535 = vrot.lane.b32.xlu0 %v2533_v53, %s4023_s17 }
0x124c   :  { %3963 = vrcp.f32 %v2697_v45 }
0x1256   :  { %v3964_v59 = vpop.eup %3963 }
0x1257   :  { %v2711_v11 = vsub.f32 1.0, %v3964_v59  ;;  %v2717_v13 = vmul.f32 %v3964_v59, %v4367_v51 }
0x129f   :  { %v2702_v61 = vpop.permute.xlu1 %2701 }
0x12a0   :  { %v2704_v62 = vmul.f32 %v3964_v59, %v2702_v61 }
0x12a2   :  { %2706 = vrot.lane.b32.xlu1 %v2704_v62, %s4023_s17 }
0x12bd   :  { %v2536_v63 = vpop.permute.xlu0 %2535 }
0x12be   :  { %v2538_v1 = vadd.f32 %v2536_v63, %v2519_v41 }
0x12c0   :  { %3965 = vtanh.f32 %v2538_v1 }
0x12ca   :  { %v3966_v2 = vpop.eup %3965 }
0x12cb   :  { %2542 = vrot.lane.b32.xlu0 %v3966_v2, %s4024_s18 }
0x1314   :  { %v2707_v3 = vpop.permute.xlu1 %2706 }
0x1315   :  { %v2709_v4 = vadd.f32 %v2707_v3, %v4170_v56 }
0x1317   :  { %3967 = vtanh.f32 %v2709_v4 }
0x1321   :  { %v3968_v44 = vpop.eup %3967 }
0x1322   :  { %2713 = vrot.lane.b32.xlu1 %v3968_v44, %s4024_s18 }
0x133d   :  { %v2543_v7 = vpop.permute.xlu0 %2542 }
0x133e   :  { %v2545_v9 = vmul.f32 %v2543_v7, %v2540_v5 }
0x1340   :  { %v4398_v10 = vadd.f32 %v2546_v8, %v2545_v9 }
0x1342   :  { %2619 = vrot.lane.b32.xlu0 %v4398_v10, %s4024_s18 }
0x1394   :  { %v2714_v12 = vpop.permute.xlu1 %2713 }
0x1395   :  { %v2716_v39 = vmul.f32 %v2714_v12, %v2711_v11 }
0x1397   :  { %v4403_v56 = vadd.f32 %v2717_v13, %v2716_v39 }
0x1399   :  { %2720 = vrot.lane.b32.xlu1 %v4403_v56, %s4024_s18 }
0x13b4   :  { %v2620_v15 = vpop.permute.xlu0 %2619 }
0x13b5   :  { %3739 = vmatmul.mubr.msk.f32.vlgmr.msra.gmra.mrb[30].mxu0 %vm122_vm2, %v2620_v15  ;;  %v3363_v15 = vld [vmem:[#allocation2 + $0x20] ss:$0 sm:$0xff] }
0x13b6   :  { %3861 = vmatpush3.bf16.msra.mxu0 %v4140_v29  ;;  %3752 = vmatprep.mubr.msk.f32.mxu0 %vm4020_vm0, %v4412_v17 }
0x13b7   :  { %3865 = vmatprep.subr.bf16.mxu0 %v4021_v6 }
0x140b   :  { %v2721_v19 = vpop.permute.xlu1 %2720 }
0x140c   :  { %3746 = vmatmul.mubr.msk.f32.vlgmr.msra.gmra.mrb[30].mxu1 %vm122_vm2, %v2721_v19  ;;  %3753 = vmatmul.mubr.msk.f32.vlgmr.msra.gmra.mrb[32].mxu0 %vm122_vm2, %v2721_v19 }
0x140d   :  { %3864 = vmatpush3.bf16.msra.mxu1 %v4179_v14  ;;  %3759 = vmatprep.mubr.msk.f32.mxu1 %vm4020_vm0, %v4412_v17 }
0x140e   :  { %3867 = vmatpush3.bf16.msra.mxu0 %v4181_v16  ;;  %3766 = vmatprep.mubr.msk.f32.mxu0 %vm4020_vm0, %v4412_v17 }
0x140f   :  { %3868 = vmatprep.subr.bf16.mxu1 %v4021_v6  ;;  %3871 = vmatprep.subr.bf16.mxu0 %v4021_v6 }
0x1488   :  { %v2689_v29 = vpop.f32.mrb[30].mxu0 }
0x1489   :  { %v2690_v20 = vadd.f32 %v4194_v24, %v2689_v29  ;;  %v3740_v21 = vpop.f32.mrb[31].mxu0  ;;  %v3092_v29 = vld [vmem:[#allocation2 + $0x90] sm:$0xff] }
0x148b   :  { %2802 = vrot.lane.b32.xlu0 %v2690_v20, %s4022_s2 }
0x14df   :  { %v2790_v22 = vpop.f32.mrb[30].mxu1  ;;  %v2886_v14 = vpop.f32.mrb[32].mxu0 }
0x14e0   :  { %v2791_v23 = vadd.f32 %v4208_v31, %v2790_v22  ;;  %v2887_v25 = vadd.f32 %v4174_v60, %v2886_v14  ;;  %v3747_v16 = vpop.f32.mrb[31].mxu1  ;;  %v3754_v26 = vpop.f32.mrb[33].mxu0 }
0x14e2   :  { %v2794_v27 = vadd.f32 %v2791_v23, %v2690_v20  ;;  %2973 = vrot.lane.b32.xlu1 %v2887_v25, %s4022_s2  ;;  %v2965_v36 = vadd.f32 %v2887_v25, %v4172_v57  ;;  %v3093_v20 = vld [vmem:[#allocation2 + $0x98] sm:$0xff] }
0x14e3   :  { %v3869_v21 = vpack.c.bf16 %v3093_v20, %v3092_v29 }
0x14e4   :  { %v3425_v28 = vmul.f32 -1.442695, %v2794_v27  ;;  %v3428_v37 = vmul.f32 -1.442695, %v2965_v36 }
0x14e6   :  { %3969 = vpow2.f32 %v3425_v28 }
0x14f0   :  { %v3970_v32 = vpop.eup %3969 }
0x14f1   :  { %v2798_v51 = vadd.f32 1.0, %v3970_v32 }
0x14f3   :  { %3971 = vrcp.f32 %v2798_v51 }
0x14f4   :  { %3973 = vpow2.f32 %v3428_v37 }
0x14fd   :  { %v3972_v33 = vpop.eup %3971  ;;  %v2803_v34 = vpop.permute.xlu0 %2802 }
0x14fe   :  { %v2805_v35 = vmul.f32 %v3972_v33, %v2803_v34  ;;  %v3974_v60 = vpop.eup %3973  ;;  %v2812_v49 = vsub.f32 1.0, %v3972_v33  ;;  %v2818_v53 = vmul.f32 %v3972_v33, %v4398_v10  ;;  %v3176_v33 = vld [vmem:[#allocation2 + $0xb0] sm:$0xff] }
0x14ff   :  { %v2969_v38 = vadd.f32 1.0, %v3974_v60  ;;  %v3431_v60 = vld [vmem:[#allocation2 + $0xa0] ss:$0 sm:$0xff] }
0x1500   :  { %2807 = vrot.lane.b32.xlu0 %v2805_v35, %s4023_s17 }
0x1501   :  { %3975 = vrcp.f32 %v2969_v38 }
0x150b   :  { %v3976_v40 = vpop.eup %3975 }
0x150c   :  { %v2983_v58 = vsub.f32 1.0, %v3976_v40  ;;  %v2989_v59 = vmul.f32 %v3976_v40, %v4403_v56 }
0x1554   :  { %v2974_v41 = vpop.permute.xlu1 %2973 }
0x1555   :  { %v2976_v42 = vmul.f32 %v3976_v40, %v2974_v41 }
0x1557   :  { %2978 = vrot.lane.b32.xlu1 %v2976_v42, %s4023_s17 }
0x1572   :  { %v2808_v43 = vpop.permute.xlu0 %2807 }
0x1573   :  { %v2810_v50 = vadd.f32 %v2808_v43, %v2791_v23  ;;  %v3256_v43 = vld [vmem:[#allocation2 + $0xc0] sm:$0xff] }
0x1575   :  { %3977 = vtanh.f32 %v2810_v50  ;;  %v3257_v50 = vld [vmem:[#allocation2 + $0xc8] sm:$0xff] }
0x157f   :  { %v3978_v46 = vpop.eup %3977 }
0x1580   :  { %2814 = vrot.lane.b32.xlu0 %v3978_v46, %s4024_s18  ;;  %v3433_v46 = vld [vmem:[#allocation2 + $0xb8] ss:$0 sm:$0xff] }
0x15c9   :  { %v2979_v0 = vpop.permute.xlu1 %2978 }
0x15ca   :  { %v2981_v47 = vadd.f32 %v2979_v0, %v4172_v57 }
0x15cc   :  { %3979 = vtanh.f32 %v2981_v47 }
0x15d6   :  { %v3980_v48 = vpop.eup %3979 }
0x15d7   :  { %2985 = vrot.lane.b32.xlu1 %v3980_v48, %s4024_s18 }
0x15f2   :  { %v2815_v52 = vpop.permute.xlu0 %2814 }
0x15f3   :  { %v2817_v54 = vmul.f32 %v2815_v52, %v2812_v49  ;;  %v3435_v52 = vld [vmem:[#allocation2 + $0xd0] ss:$0 sm:$0xff] }
0x15f5   :  { %v2819_v55 = vadd.f32 %v2818_v53, %v2817_v54 }
0x15f7   :  { %2891 = vrot.lane.b32.xlu0 %v2819_v55, %s4024_s18 }
0x1649   :  { %v2986_v45 = vpop.permute.xlu1 %2985 }
0x164a   :  { %v2988_v61 = vmul.f32 %v2986_v45, %v2983_v58 }
0x164c   :  { %v2990_v62 = vadd.f32 %v2989_v59, %v2988_v61 }
0x164e   :  { %2992 = vrot.lane.b32.xlu1 %v2990_v62, %s4024_s18 }
0x1669   :  { %v2892_v57 = vpop.permute.xlu0 %2891 }
0x166a   :  { %3760 = vmatmul.mubr.msk.f32.vlgmr.msra.gmra.mrb[32].mxu1 %vm122_vm2, %v2892_v57 }
0x166b   :  { %3773 = vmatprep.mubr.msk.f32.mxu1 %vm4020_vm0, %v4412_v17  ;;  %3870 = vmatpush3.bf16.msra.mxu1 %v3869_v21 }
0x166c   :  { %3874 = vmatprep.subr.bf16.mxu1 %v4021_v6  ;;  %v3175_v6 = vld [vmem:[#allocation2 + $0xa8] sm:$0xff] }
0x166d   :  { %v3872_v34 = vpack.c.bf16 %v3176_v33, %v3175_v6 }
0x16c0   :  { %v2993_v63 = vpop.permute.xlu1 %2992 }
0x16c1   :  { %3767 = vmatmul.mubr.msk.f32.vlgmr.msra.gmra.mrb[34].mxu0 %vm122_vm2, %v2993_v63 }
0x16c2   :  { %3780 = vmatprep.mubr.msk.f32.mxu0 %vm4020_vm0, %v4412_v17  ;;  %3873 = vmatpush3.bf16.msra.mxu0 %v3872_v34 }
0x173d   :  { %v2961_v1 = vpop.f32.mrb[32].mxu1 }
0x173e   :  { %v2962_v2 = vadd.f32 %v4194_v24, %v2961_v1  ;;  %v3761_v3 = vpop.f32.mrb[33].mxu1 }
0x1740   :  { %3074 = vrot.lane.b32.xlu0 %v2962_v2, %s4022_s2 }
0x1794   :  { %v3062_v4 = vpop.f32.mrb[34].mxu0 }
0x1795   :  { %v3063_v44 = vadd.f32 %v4208_v31, %v3062_v4  ;;  %v3768_v5 = vpop.f32.mrb[35].mxu0  ;;  %v193_v31 = vadd.f32 %v3363_v15, %v4158_v30 }
0x1797   :  { %v3066_v7 = vadd.f32 %v3063_v44, %v2962_v2  ;;  %v196_v19 = vsel %vm35_vm1, %v193_v31, -inf }
0x1799   :  { %v3430_v8 = vmul.f32 -1.442695, %v3066_v7 }
0x179b   :  { %3981 = vpow2.f32 %v3430_v8 }
0x17a5   :  { %v3982_v9 = vpop.eup %3981 }
0x17a6   :  { %v3070_v10 = vadd.f32 1.0, %v3982_v9 }
0x17a8   :  { %3983 = vrcp.f32 %v3070_v10 }
0x17b2   :  { %v3984_v11 = vpop.eup %3983  ;;  %v3075_v12 = vpop.permute.xlu0 %3074 }
0x17b3   :  { %v3077_v13 = vmul.f32 %v3984_v11, %v3075_v12  ;;  %v3084_v22 = vsub.f32 1.0, %v3984_v11  ;;  %v3090_v23 = vmul.f32 %v3984_v11, %v2819_v55 }
0x17b5   :  { %3079 = vrot.lane.b32.xlu1 %v3077_v13, %s4023_s17 }
0x1827   :  { %v3080_v39 = vpop.permute.xlu1 %3079 }
0x1828   :  { %v3082_v24 = vadd.f32 %v3080_v39, %v3063_v44 }
0x182a   :  { %3985 = vtanh.f32 %v3082_v24 }
0x1834   :  { %v3986_v56 = vpop.eup %3985 }
0x1835   :  { %3086 = vrot.lane.b32.xlu0 %v3986_v56, %s4024_s18 }
0x1854   :  { %197 = vmax.xlane.f32.xlu0 %v196_v19 }
0x18a7   :  { %v3087_v14 = vpop.permute.xlu0 %3086 }
0x18a8   :  { %v3089_v25 = vmul.f32 %v3087_v14, %v3084_v22 }
0x18aa   :  { %v3091_v16 = vadd.f32 %v3090_v23, %v3089_v25 }
0x18ac   :  { %3100 = vrot.lane.b32.xlu1 %v3091_v16, %s4024_s18 }
0x18e1   :  { %v198_v26 = vpop.xlane.xlu0 %197 }
0x18e2   :  { %v199_v27 = vsub.f32 %v193_v31, %v198_v26 }
0x18e4   :  { %v200_v28 = vmul.f32 1.442695, %v199_v27 }
0x18e6   :  { %3987 = vpow2.f32 %v200_v28 }
0x18f0   :  { %v3988_v30 = vpop.eup %3987 }
0x18f1   :  { %v202_v32 = vsel %vm35_vm1, %v3988_v30, 0.0 }
0x18f2   :  { %203 = vadd.xlane.f32.xlu1 %v202_v32 }
0x191e   :  { %v3101_v51 = vpop.permute.xlu1 %3100 }
0x191f   :  { %3774 = vmatmul.mubr.msk.f32.vlgmr.msra.gmra.mrb[34].mxu1 %vm122_vm2, %v3101_v51 }
0x1920   :  { %3787 = vmatprep.mubr.msk.f32.mxu1 %vm4020_vm0, %v4412_v17  ;;  %v3875_v17 = vpack.c.bf16 %v3257_v50, %v3256_v43 }
0x1922   :  { %3876 = vmatpush3.bf16.msra.mxu1 %v3875_v17 }
0x197f   :  { %v204_v35 = vpop.xlane.xlu1 %203 }
0x1980   :  { %3989 = vrcp.f32 %v204_v35 }
0x198a   :  { %v3990_v36 = vpop.eup %3989 }
0x198b   :  { %v206_v37 = vmul.f32 %v3990_v36, %v3988_v30 }
0x198d   :  { %3345 = vrot.lane.b32.xlu1 %v206_v37, %s4025_s21 }
0x19f2   :  { %v3170_v38 = vpop.f32.mrb[34].mxu1 }
0x19f3   :  { %v3171_v40 = vadd.f32 %v3431_v60, %v3170_v38  ;;  %v3775_v41 = vpop.f32.mrb[35].mxu1 }
0x19f5   :  { %v3174_v42 = vmax.f32 %v3171_v40, 0.0 }
0x19f7   :  { %3781 = vmatmul.mubr.msk.f32.vlgmr.msra.gmra.mrb[36].mxu0 %vm122_vm2, %v3174_v42 }
0x19ff   :  { %v3346_v45 = vpop.permute.xlu1 %3345 }
0x1aca   :  { %v3251_v0 = vpop.f32.mrb[36].mxu0 }
0x1acb   :  { %v3252_v47 = vadd.f32 %v3433_v46, %v3251_v0  ;;  %v3782_v48 = vpop.f32.mrb[37].mxu0 }
0x1acd   :  { %v3255_v49 = vmax.f32 %v3252_v47, 0.0 }
0x1acf   :  { %3339 = vrot.lane.b32.xlu0 %v3255_v49, %s4023_s17  ;;  %3788 = vmatmul.mubr.msk.f32.vlgmr.msra.gmra.mrb[36].mxu1 %vm122_vm2, %v3255_v49 }
0x1ad3   :  { %3350 = vrot.lane.b32.xlu0 %v4077_v18, %s4022_s2 }
0x1b41   :  { %v3340_v53 = vpop.permute.xlu0 %3339 }
0x1b45   :  { %v3351_v59 = vpop.permute.xlu0 %3350 }
0x1ba2   :  { %v3332_v54 = vpop.f32.mrb[36].mxu1 }
0x1ba3   :  { %v3333_v55 = vadd.f32 %v3435_v52, %v3332_v54  ;;  %v3789_v58 = vpop.f32.mrb[37].mxu1 }
0x1ba5   :  { %3338 = vst.msk [vmem:[%s4481_s3] sm:$0xff] %vm3337_vm5, %v3333_v55 }
0x1ba6   :  { %3343 = vst.msk [vmem:[%s4481_s3] sm:$0xff] %vm3342_vm6, %v3340_v53 }
0x1ba7   :  { %3349 = vst.msk [vmem:[%s4481_s3] sm:$0xff] %vm3348_vm7, %v3346_v45 }
0x1ba8   :  { %3354 = vst.msk [vmem:[%s4481_s3] sm:$0xff] %vm3353_vm8, %v3351_v59 }
0x1ba9   :  { %3359 = vsyncpa [#allocation3], 1 }

</bundles_post_ra>
